<compile_context>
chip_gen: v7x
topology: tpu7x:2x2x1
jax: 0.10.0
libtpu: 0.0.40
codegen_flags: <defaults>
</compile_context>

<pallas_src>
import math

import jax
import jax.numpy as jnp
from jax.experimental import pallas as pl
from jax.experimental.pallas import tpu as pltpu


def _round_up(x, m):
    return ((x + m - 1) // m) * m


def _vmem_limit_bytes():
    """~0.75x of this generation's physical per-core VMEM (96 MiB v5e/v6e, 48 MiB v7x)."""
    try:
        cap = int(pltpu.get_tpu_info().vmem_capacity_bytes)
    except Exception:
        cap = 64 * 1024 * 1024          # conservative floor: v7x per-core VMEM
    return max(16 * 1024 * 1024, (3 * cap) // 4)


def _erf(x):
    # Abramowitz & Stegun 7.1.26 rational approximation (|err| < 1.5e-7) built
    # only from ops that lower cleanly on Mosaic. Exact divide (no approx
    # reciprocal): the kernel is HBM-bound, so the EUP shortcut buys nothing.
    a1, a2, a3, a4, a5 = (0.254829592, -0.284496736, 1.421413741,
                          -1.453152027, 1.061405429)
    p = 0.3275911
    ax = jnp.abs(x)
    t = 1.0 / (1.0 + p * ax)
    poly = ((((a5 * t + a4) * t + a3) * t + a2) * t + a1) * t
    y = 1.0 - poly * jnp.exp(-ax * ax)
    return jnp.where(x < 0.0, -y, y)


def _gelu_exact(x):
    # PyTorch F.gelu default (approximate='none'): x * 0.5 * (1 + erf(x/sqrt(2)))
    return x * 0.5 * (1.0 + _erf(x * (1.0 / math.sqrt(2.0))))


def _batched_matvec(w, x):
    """torch.bmm(w, x.unsqueeze(2)).squeeze(2): (B, N, M) x (B, M) -> (B, N), f32.

    VPU broadcast-multiply + lane reduction (a per-batch GEMV fills <1/256 of
    the MXU, and f32 MXU is multi-pass on v6e/v7x, so no dot_general branch).
    The output (N) dimension is chunked so the f32 broadcast product stays well
    inside the vreg file instead of spilling at larger TB / inner. Weights may
    arrive as bf16 and are upcast to f32 right at the use site (safe on v5e).
    """
    b, n, m = w.shape
    xb = x[:, None, :].astype(jnp.float32)
    m_pad = max(128, _round_up(m, 128))
    # keep each chunk's f32 product under ~64 KiB of vregs
    rows = _round_up(max(8, (64 * 1024) // max(1, b * m_pad * 4)), 8)
    if rows >= n:
        return jnp.sum(w.astype(jnp.float32) * xb, axis=-1)
    parts = []
    for start in range(0, n, rows):                      # static trip count
        stop = min(start + rows, n)
        parts.append(jnp.sum(w[:, start:stop, :].astype(jnp.float32) * xb, axis=-1))
    return jnp.concatenate(parts, axis=-1)


def _hebby_forward_kernel(x_ref, h_ref, lw_ref, lb_ref,
                          i2ow_ref, i2ob_ref, sgw_ref, sgb_ref,
                          heads_ref, comb_ref):
    l = pl.program_id(1)

    # Layer 0: torch.cat([input, hidden], dim=1). Concatenate the tiny
    # activations (cheap) instead of lane-slicing the big weight at a
    # misaligned offset; result is carried in the persistent VMEM scratch.
    @pl.when(l == 0)
    def _():
        comb_ref[...] = jnp.concatenate([x_ref[...], h_ref[...]], axis=1)

    # One HebbianLinear layer + exact-erf GELU. Only this layer's bf16 weight
    # slab is resident (layer axis is on the grid); accumulate in f32.
    y = _batched_matvec(lw_ref[0], comb_ref[...]) + lb_ref[0]
    comb_ref[...] = _gelu_exact(y)

    # After the last recurrent layer: fused i2o / self_grad heads -> a single
    # (TB, 2*O) store (one output stream; v5e has only one vst slot).
    # The PyTorch i2h(...) result is discarded (hidden is zeroed before tanh),
    # so nothing is computed or stored for it here.
    @pl.when(l == pl.num_programs(1) - 1)
    def _():
        c = comb_ref[...]
        out = _batched_matvec(i2ow_ref[...], c) + i2ob_ref[...]
        sg = _batched_matvec(sgw_ref[...], c) + sgb_ref[...]
        heads_ref[...] = jnp.concatenate([out, sg], axis=1)


def _choose_batch_tile(batch, num_layers, inner, in_f, hid_f, out_f, budget_bytes):
    """Largest batch tile whose padded, double-buffered blocks fit the VMEM budget.

    Accounts for (sublane, 128-lane) VMEM padding, never exceeds the budget
    (floor is the smallest legal tile), allows partial last blocks (the grid
    uses pl.cdiv), and for batch >= 16 caps the tile so the parallel batch
    axis has at least two grid steps (keeps both v7x TensorCores busy).
    """
    def padded(rows, cols, itemsize):
        sub = 8 * (4 // itemsize)            # 8 sublanes (f32) / 16 (bf16)
        return _round_up(max(rows, 1), sub) * _round_up(max(cols, 1), 128) * itemsize

    wbytes = 2                               # bf16 streamed weights

    def tile_bytes(tb):
        b = 0
        b += 2 * tb * padded(inner, inner, wbytes)               # one layer's weights (x2 dbl-buf)
        b += 2 * tb * 2 * padded(out_f, inner, wbytes)           # i2o + self_grad weights
        b += 2 * (padded(tb, in_f, 4) + padded(tb, hid_f, 4))    # input / hidden
        b += 2 * padded(tb, 2 * out_f, 4)                        # fused heads output
        b += padded(tb, inner, 4)                                # combined carry scratch
        b += 2 * (num_layers * padded(1, inner, 4) + 2 * padded(1, out_f, 4))  # biases
        return b

    if batch <= 8:
        candidates = [batch]
    else:
        candidates = sorted({batch, *range(8, batch, 8)}, reverse=True)

    tb = None
    for cand in candidates:
        if tile_bytes(cand) <= budget_bytes:
            tb = cand
            break
    if tb is None:
        tb = min(batch, 8)                   # smallest legal tile; nothing smaller possible

    if batch >= 16:                          # megacore: ensure >= 2 parallel grid steps
        tb = max(8, min(tb, _round_up((batch + 1) // 2, 8)))
    return tb


def hebby_rnn_forward(inp, hidden, layer_w, layer_b, i2o_w, i2o_b, sg_w, sg_b):
    B, in_f = inp.shape
    hid_f = hidden.shape[1]
    inner = in_f + hid_f
    L = layer_w.shape[0]
    O = i2o_w.shape[1]
    O2 = 2 * O

    vmem_limit = _vmem_limit_bytes()
    budget = (7 * vmem_limit) // 8           # leave headroom under the compiler limit
    TB = _choose_batch_tile(B, L, inner, in_f, hid_f, O, budget)
    grid = (pl.cdiv(B, TB), L)               # batch tiles parallel, layers sequential

    heads = pl.pallas_call(
        _hebby_forward_kernel,
        out_shape=jax.ShapeDtypeStruct((B, O2), jnp.float32),
        grid=grid,
        in_specs=[
            pl.BlockSpec((TB, in_f), lambda i, l: (i, 0)),
            pl.BlockSpec((TB, hid_f), lambda i, l: (i, 0)),
            pl.BlockSpec((1, TB, inner, inner), lambda i, l: (l, i, 0, 0)),
            pl.BlockSpec((1, 1, inner), lambda i, l: (l, 0, 0)),
            pl.BlockSpec((TB, O, inner), lambda i, l: (i, 0, 0)),
            pl.BlockSpec((1, O), lambda i, l: (0, 0)),
            pl.BlockSpec((TB, O, inner), lambda i, l: (i, 0, 0)),
            pl.BlockSpec((1, O), lambda i, l: (0, 0)),
        ],
        out_specs=pl.BlockSpec((TB, O2), lambda i, l: (i, 0)),
        scratch_shapes=[pltpu.VMEM((TB, inner), jnp.float32)],   # `combined` carry
        compiler_params=pltpu.CompilerParams(
            dimension_semantics=("parallel", "arbitrary"),
            vmem_limit_bytes=vmem_limit),
    )(inp, hidden, layer_w, layer_b, i2o_w, i2o_b, sg_w, sg_b)

    output = heads[:, :O]
    self_grad = heads[:, O:]
    # HebbyRNN: hidden = tanh(zeros_like(i2h(combined))) == zeros; the i2h value
    # is discarded, so the zeros are produced in the wrapper rather than
    # streaming an all-zero output out of the kernel.
    hid = jnp.zeros((B, hid_f), jnp.float32)
    return output, hid, self_grad


def init_params(key, input_size, hidden_size, output_size, num_layers, batch_size):
    inner = input_size + hidden_size
    ks = jax.random.split(key, 6)
    # HebbianLinear candidate_weights are (batch, out, in); zeros at __init__ in
    # PyTorch — use small deterministic random values so the kernel does real
    # work. Per-batch weights are stored/streamed as bf16 (cast ONCE here,
    # outside the per-step forward); the kernel accumulates in f32.
    layer_w = (0.1 * jax.random.normal(
        ks[0], (num_layers, batch_size, inner, inner), jnp.float32)).astype(jnp.bfloat16)
    bound = 1.0 / math.sqrt(inner)
    layer_b = jax.random.uniform(ks[1], (num_layers, 1, inner), jnp.float32, -bound, bound)
    i2o_w = (0.1 * jax.random.normal(
        ks[2], (batch_size, output_size, inner), jnp.float32)).astype(jnp.bfloat16)
    i2o_b = jax.random.uniform(ks[3], (1, output_size), jnp.float32, -bound, bound)
    sg_w = (0.1 * jax.random.normal(
        ks[4], (batch_size, output_size, inner), jnp.float32)).astype(jnp.bfloat16)
    sg_b = jax.random.uniform(ks[5], (1, output_size), jnp.float32, -bound, bound)
    return layer_w, layer_b, i2o_w, i2o_b, sg_w, sg_b


def reference_forward(inp, hidden, layer_w, layer_b, i2o_w, i2o_b, sg_w, sg_b):
    # Pure-JAX reference matching the PyTorch forward (exact erf GELU), using
    # the same bf16 parameter values upcast to f32.
    lw = layer_w.astype(jnp.float32)
    combined = jnp.concatenate([inp, hidden], axis=1)
    for l in range(lw.shape[0]):
        y = jnp.einsum('bnm,bm->bn', lw[l], combined) + layer_b[l]
        combined = jax.nn.gelu(y, approximate=False)
    output = jnp.einsum('bnm,bm->bn', i2o_w.astype(jnp.float32), combined) + i2o_b
    self_grad = jnp.einsum('bnm,bm->bn', sg_w.astype(jnp.float32), combined) + sg_b
    hid = jnp.zeros((inp.shape[0], hidden.shape[1]), jnp.float32)
    return output, hid, self_grad


if __name__ == "__main__":
    key = jax.random.PRNGKey(0)
    batch_size, input_size, hidden_size, output_size, num_layers = 2, 16, 32, 16, 2

    kx, kp = jax.random.split(key, 2)
    x = jax.random.normal(kx, (batch_size, input_size), jnp.float32)
    h0 = jnp.zeros((batch_size, hidden_size), jnp.float32)   # HebbyRNN.initHidden
    params = init_params(kp, input_size, hidden_size, output_size,
                         num_layers, batch_size)

    fwd = jax.jit(hebby_rnn_forward)
    out, hid, self_grad = fwd(x, h0, *params)
    jax.block_until_ready((out, hid, self_grad))

    ro, rh, rs = reference_forward(x, h0, *params)
    assert out.shape == (batch_size, output_size)
    assert hid.shape == (batch_size, hidden_size)
    assert self_grad.shape == (batch_size, output_size)
    # Kernel and reference use the same bf16 weights, so the tolerance only has
    # to absorb the rational-erf approximation and accumulation-order effects.
    assert jnp.allclose(out, ro, rtol=1e-3, atol=1e-3)
    assert jnp.allclose(self_grad, rs, rtol=1e-3, atol=1e-3)
    assert jnp.allclose(hid, rh)
    print("KERNEL_OK")
</pallas_src>

<mosaic_0001>
module attributes {stable_mosaic.version = 11 : i64} {
  func.func @_hebby_forward_kernel(%arg0: i32, %arg1: i32, %arg2: memref<2x16xf32, #tpu.memory_space<vmem>>, %arg3: memref<2x32xf32, #tpu.memory_space<vmem>>, %arg4: memref<1x2x48x48xbf16, #tpu.memory_space<vmem>>, %arg5: memref<1x1x48xf32, #tpu.memory_space<vmem>>, %arg6: memref<2x16x48xbf16, #tpu.memory_space<vmem>>, %arg7: memref<1x16xf32, #tpu.memory_space<vmem>>, %arg8: memref<2x16x48xbf16, #tpu.memory_space<vmem>>, %arg9: memref<1x16xf32, #tpu.memory_space<vmem>>, %arg10: memref<2x32xf32, #tpu.memory_space<vmem>>, %arg11: memref<2x48xf32, #tpu.memory_space<vmem>>) attributes {dimension_semantics = [#tpu.dimension_semantics<parallel>, #tpu.dimension_semantics<arbitrary>], iteration_bounds = array<i64: 1, 2>, scalar_prefetch = 0 : i64, scratch_operands = 1 : i64, tpu.core_type = #tpu.core_type<tc>, window_params = [{transform_indices = @transform_0, window_bounds = array<i64: 2, 16>}, {transform_indices = @transform_1, window_bounds = array<i64: 2, 32>}, {transform_indices = @transform_2, window_bounds = array<i64: 1, 2, 48, 48>}, {transform_indices = @transform_3, window_bounds = array<i64: 1, 1, 48>}, {transform_indices = @transform_4, window_bounds = array<i64: 2, 16, 48>}, {pipeline_mode = #tpu.pipeline_mode<synchronous>, transform_indices = @transform_5, window_bounds = array<i64: 1, 16>}, {transform_indices = @transform_6, window_bounds = array<i64: 2, 16, 48>}, {pipeline_mode = #tpu.pipeline_mode<synchronous>, transform_indices = @transform_7, window_bounds = array<i64: 1, 16>}, {transform_indices = @transform_8, window_bounds = array<i64: 2, 32>}]} {
    %c0_i32 = arith.constant 0 : i32
    %0 = arith.cmpi eq, %arg1, %c0_i32 : i32
    %1 = arith.extui %0 : i1 to i32
    %c0_i32_0 = arith.constant 0 : i32
    %2 = arith.cmpi ne, %1, %c0_i32_0 : i32
    scf.if %2 {
      %c0_27 = arith.constant 0 : index
      %c0_28 = arith.constant 0 : index
      %59 = vector.load %arg2[%c0_27, %c0_28] : memref<2x16xf32, #tpu.memory_space<vmem>>, vector<2x16xf32>
      %c0_29 = arith.constant 0 : index
      %c0_30 = arith.constant 0 : index
      %60 = vector.load %arg3[%c0_29, %c0_30] : memref<2x32xf32, #tpu.memory_space<vmem>>, vector<2x32xf32>
      %61 = tpu.concatenate %59, %60 in 1 : vector<2x16xf32>, vector<2x32xf32> -> vector<2x48xf32>
      %c0_31 = arith.constant 0 : index
      %c0_32 = arith.constant 0 : index
      %62 = vector.load %arg11[%c0_31, %c0_32] : memref<2x48xf32, #tpu.memory_space<vmem>>, vector<2x48xf32>
      tpu.vector_store %arg11[%c0_31, %c0_32], %61 {strides = array<i32>} : memref<2x48xf32, #tpu.memory_space<vmem>>, vector<2x48xf32>,
    } else {
    }
    %c0 = arith.constant 0 : index
    %c0_1 = arith.constant 0 : index
    %c0_2 = arith.constant 0 : index
    %c0_3 = arith.constant 0 : index
    %3 = vector.load %arg4[%c0, %c0_1, %c0_2, %c0_3] : memref<1x2x48x48xbf16, #tpu.memory_space<vmem>>, vector<1x2x48x48xbf16>
    %4 = vector.shape_cast %3 : vector<1x2x48x48xbf16> to vector<2x48x48xbf16>
    %c0_4 = arith.constant 0 : index
    %c0_5 = arith.constant 0 : index
    %5 = vector.load %arg11[%c0_4, %c0_5] : memref<2x48xf32, #tpu.memory_space<vmem>>, vector<2x48xf32>
    %6 = vector.shape_cast %5 : vector<2x48xf32> to vector<2x1x48xf32>
    %7 = arith.extf %4 : vector<2x48x48xbf16> to vector<2x48x48xf32>
    %8 = vector.broadcast %6 : vector<2x1x48xf32> to vector<2x48x48xf32>
    %9 = arith.mulf %7, %8 : vector<2x48x48xf32>
    %cst = arith.constant dense<0.000000e+00> : vector<2x48xf32>
    %10 = vector.multi_reduction <add>, %9, %cst [2] : vector<2x48x48xf32> to vector<2x48xf32>
    %c0_6 = arith.constant 0 : index
    %c0_7 = arith.constant 0 : index
    %c0_8 = arith.constant 0 : index
    %11 = vector.load %arg5[%c0_6, %c0_7, %c0_8] : memref<1x1x48xf32, #tpu.memory_space<vmem>>, vector<1x1x48xf32>
    %12 = vector.shape_cast %11 : vector<1x1x48xf32> to vector<1x48xf32>
    %13 = vector.broadcast %12 : vector<1x48xf32> to vector<2x48xf32>
    %14 = arith.addf %10, %13 : vector<2x48xf32>
    %cst_9 = arith.constant 5.000000e-01 : f32
    %15 = vector.broadcast %cst_9 : f32 to vector<2x48xf32>
    %16 = arith.mulf %14, %15 : vector<2x48xf32>
    %cst_10 = arith.constant 0.707106769 : f32
    %17 = vector.broadcast %cst_10 : f32 to vector<2x48xf32>
    %18 = arith.mulf %14, %17 : vector<2x48xf32>
    %19 = math.absf %18 : vector<2x48xf32>
    %cst_11 = arith.constant 0.327591091 : f32
    %20 = vector.broadcast %cst_11 : f32 to vector<2x48xf32>
    %21 = arith.mulf %20, %19 : vector<2x48xf32>
    %cst_12 = arith.constant 1.000000e+00 : f32
    %22 = vector.broadcast %cst_12 : f32 to vector<2x48xf32>
    %23 = arith.addf %22, %21 : vector<2x48xf32>
    %cst_13 = arith.constant 1.000000e+00 : f32
    %24 = vector.broadcast %cst_13 : f32 to vector<2x48xf32>
    %25 = arith.divf %24, %23 : vector<2x48xf32>
    %cst_14 = arith.constant 1.06140542 : f32
    %26 = vector.broadcast %cst_14 : f32 to vector<2x48xf32>
    %27 = arith.mulf %26, %25 : vector<2x48xf32>
    %cst_15 = arith.constant -1.45315206 : f32
    %28 = vector.broadcast %cst_15 : f32 to vector<2x48xf32>
    %29 = arith.addf %27, %28 : vector<2x48xf32>
    %30 = arith.mulf %29, %25 : vector<2x48xf32>
    %cst_16 = arith.constant 1.42141378 : f32
    %31 = vector.broadcast %cst_16 : f32 to vector<2x48xf32>
    %32 = arith.addf %30, %31 : vector<2x48xf32>
    %33 = arith.mulf %32, %25 : vector<2x48xf32>
    %cst_17 = arith.constant -0.284496725 : f32
    %34 = vector.broadcast %cst_17 : f32 to vector<2x48xf32>
    %35 = arith.addf %33, %34 : vector<2x48xf32>
    %36 = arith.mulf %35, %25 : vector<2x48xf32>
    %cst_18 = arith.constant 0.254829586 : f32
    %37 = vector.broadcast %cst_18 : f32 to vector<2x48xf32>
    %38 = arith.addf %36, %37 : vector<2x48xf32>
    %39 = arith.mulf %38, %25 : vector<2x48xf32>
    %cst_19 = arith.constant 0.000000e+00 : f32
    %40 = vector.broadcast %cst_19 : f32 to vector<2x48xf32>
    %41 = arith.subf %40, %19 : vector<2x48xf32>
    %42 = arith.mulf %41, %19 : vector<2x48xf32>
    %43 = math.exp %42 : vector<2x48xf32>
    %44 = arith.mulf %39, %43 : vector<2x48xf32>
    %cst_20 = arith.constant 1.000000e+00 : f32
    %45 = vector.broadcast %cst_20 : f32 to vector<2x48xf32>
    %46 = arith.subf %45, %44 : vector<2x48xf32>
    %cst_21 = arith.constant 0.000000e+00 : f32
    %47 = vector.broadcast %cst_21 : f32 to vector<2x48xf32>
    %48 = arith.cmpf olt, %18, %47 : vector<2x48xf32>
    %cst_22 = arith.constant 0.000000e+00 : f32
    %49 = vector.broadcast %cst_22 : f32 to vector<2x48xf32>
    %50 = arith.subf %49, %46 : vector<2x48xf32>
    %51 = arith.select %48, %50, %46 : vector<2x48xi1>, vector<2x48xf32>
    %cst_23 = arith.constant 1.000000e+00 : f32
    %52 = vector.broadcast %cst_23 : f32 to vector<2x48xf32>
    %53 = arith.addf %52, %51 : vector<2x48xf32>
    %54 = arith.mulf %16, %53 : vector<2x48xf32>
    %c0_24 = arith.constant 0 : index
    %c0_25 = arith.constant 0 : index
    %55 = vector.load %arg11[%c0_24, %c0_25] : memref<2x48xf32, #tpu.memory_space<vmem>>, vector<2x48xf32>
    tpu.vector_store %arg11[%c0_24, %c0_25], %54 {strides = array<i32>} : memref<2x48xf32, #tpu.memory_space<vmem>>, vector<2x48xf32>,
    %c1_i32 = arith.constant 1 : i32
    %56 = arith.cmpi eq, %arg1, %c1_i32 : i32
    %57 = arith.extui %56 : i1 to i32
    %c0_i32_26 = arith.constant 0 : i32
    %58 = arith.cmpi ne, %57, %c0_i32_26 : i32
    scf.if %58 {
      %c0_27 = arith.constant 0 : index
      %c0_28 = arith.constant 0 : index
      %59 = vector.load %arg11[%c0_27, %c0_28] : memref<2x48xf32, #tpu.memory_space<vmem>>, vector<2x48xf32>
      %c0_29 = arith.constant 0 : index
      %c0_30 = arith.constant 0 : index
      %c0_31 = arith.constant 0 : index
      %60 = vector.load %arg6[%c0_29, %c0_30, %c0_31] : memref<2x16x48xbf16, #tpu.memory_space<vmem>>, vector<2x16x48xbf16>
      %61 = vector.shape_cast %59 : vector<2x48xf32> to vector<2x1x48xf32>
      %62 = arith.extf %60 : vector<2x16x48xbf16> to vector<2x16x48xf32>
      %63 = vector.broadcast %61 : vector<2x1x48xf32> to vector<2x16x48xf32>
      %64 = arith.mulf %62, %63 : vector<2x16x48xf32>
      %cst_32 = arith.constant dense<0.000000e+00> : vector<2x16xf32>
      %65 = vector.multi_reduction <add>, %64, %cst_32 [2] : vector<2x16x48xf32> to vector<2x16xf32>
      %c0_33 = arith.constant 0 : index
      %c0_34 = arith.constant 0 : index
      %66 = vector.load %arg7[%c0_33, %c0_34] : memref<1x16xf32, #tpu.memory_space<vmem>>, vector<1x16xf32>
      %67 = vector.broadcast %66 : vector<1x16xf32> to vector<2x16xf32>
      %68 = arith.addf %65, %67 : vector<2x16xf32>
      %c0_35 = arith.constant 0 : index
      %c0_36 = arith.constant 0 : index
      %c0_37 = arith.constant 0 : index
      %69 = vector.load %arg8[%c0_35, %c0_36, %c0_37] : memref<2x16x48xbf16, #tpu.memory_space<vmem>>, vector<2x16x48xbf16>
      %70 = vector.shape_cast %59 : vector<2x48xf32> to vector<2x1x48xf32>
      %71 = arith.extf %69 : vector<2x16x48xbf16> to vector<2x16x48xf32>
      %72 = vector.broadcast %70 : vector<2x1x48xf32> to vector<2x16x48xf32>
      %73 = arith.mulf %71, %72 : vector<2x16x48xf32>
      %cst_38 = arith.constant dense<0.000000e+00> : vector<2x16xf32>
      %74 = vector.multi_reduction <add>, %73, %cst_38 [2] : vector<2x16x48xf32> to vector<2x16xf32>
      %c0_39 = arith.constant 0 : index
      %c0_40 = arith.constant 0 : index
      %75 = vector.load %arg9[%c0_39, %c0_40] : memref<1x16xf32, #tpu.memory_space<vmem>>, vector<1x16xf32>
      %76 = vector.broadcast %75 : vector<1x16xf32> to vector<2x16xf32>
      %77 = arith.addf %74, %76 : vector<2x16xf32>
      %78 = tpu.concatenate %68, %77 in 1 : vector<2x16xf32>, vector<2x16xf32> -> vector<2x32xf32>
      %c0_41 = arith.constant 0 : index
      %c0_42 = arith.constant 0 : index
      %79 = vector.load %arg10[%c0_41, %c0_42] : memref<2x32xf32, #tpu.memory_space<vmem>>, vector<2x32xf32>
      tpu.vector_store %arg10[%c0_41, %c0_42], %78 {strides = array<i32>} : memref<2x32xf32, #tpu.memory_space<vmem>>, vector<2x32xf32>,
    } else {
    }
    return
  }
  func.func @transform_0(%arg0: i32, %arg1: i32) -> (i32, i32) {
    %c0_i32 = arith.constant 0 : i32
    %c0_i32_0 = arith.constant 0 : i32
    return %arg0, %c0_i32 : i32, i32
  }
  func.func @transform_1(%arg0: i32, %arg1: i32) -> (i32, i32) {
    %c0_i32 = arith.constant 0 : i32
    %c0_i32_0 = arith.constant 0 : i32
    return %arg0, %c0_i32 : i32, i32
  }
  func.func @transform_2(%arg0: i32, %arg1: i32) -> (i32, i32, i32, i32) {
    %c0_i32 = arith.constant 0 : i32
    %c0_i32_0 = arith.constant 0 : i32
    %c0_i32_1 = arith.constant 0 : i32
    return %arg1, %arg0, %c0_i32, %c0_i32_0 : i32, i32, i32, i32
  }
  func.func @transform_3(%arg0: i32, %arg1: i32) -> (i32, i32, i32) {
    %c0_i32 = arith.constant 0 : i32
    %c0_i32_0 = arith.constant 0 : i32
    %c0_i32_1 = arith.constant 0 : i32
    return %arg1, %c0_i32, %c0_i32_0 : i32, i32, i32
  }
  func.func @transform_4(%arg0: i32, %arg1: i32) -> (i32, i32, i32) {
    %c0_i32 = arith.constant 0 : i32
    %c0_i32_0 = arith.constant 0 : i32
    %c0_i32_1 = arith.constant 0 : i32
    return %arg0, %c0_i32, %c0_i32_0 : i32, i32, i32
  }
  func.func @transform_5(%arg0: i32, %arg1: i32) -> (i32, i32) {
    %c0_i32 = arith.constant 0 : i32
    %c0_i32_0 = arith.constant 0 : i32
    %c0_i32_1 = arith.constant 0 : i32
    return %c0_i32, %c0_i32_0 : i32, i32
  }
  func.func @transform_6(%arg0: i32, %arg1: i32) -> (i32, i32, i32) {
    %c0_i32 = arith.constant 0 : i32
    %c0_i32_0 = arith.constant 0 : i32
    %c0_i32_1 = arith.constant 0 : i32
    return %arg0, %c0_i32, %c0_i32_0 : i32, i32, i32
  }
  func.func @transform_7(%arg0: i32, %arg1: i32) -> (i32, i32) {
    %c0_i32 = arith.constant 0 : i32
    %c0_i32_0 = arith.constant 0 : i32
    %c0_i32_1 = arith.constant 0 : i32
    return %c0_i32, %c0_i32_0 : i32, i32
  }
  func.func @transform_8(%arg0: i32, %arg1: i32) -> (i32, i32) {
    %c0_i32 = arith.constant 0 : i32
    %c0_i32_0 = arith.constant 0 : i32
    return %arg0, %c0_i32 : i32, i32
  }
}

</mosaic_0001>

<bundles_post_ra>
// kernel: hebby_rnn_forward.1
= control target key start
LH: loop header
LB: loop body
LE: loop exit
PB: predicated region body
PF: predicated region fallthrough
CT: control target
= control target key end

     0   :  { %s2507_s0 = inlined_call_operand.vmem [shape: f32[2,16], index: 0, kind: input, shape index: {}]   ;;  %s2508_s1 = inlined_call_operand.vmem [shape: f32[2,32], index: 1, kind: input, shape index: {}]   ;;  %s2509_s2 = inlined_call_operand.hbm [shape: bf16[2,2,48,48], index: 2, kind: input, shape index: {}]   ;;  %s2510_s3 = inlined_call_operand.hbm [shape: f32[2,1,48], index: 3, kind: input, shape index: {}]   ;;  %s2511_s4 = inlined_call_operand.vmem [shape: bf16[2,16,48], index: 4, kind: input, shape index: {}]   ;;  %s2512_s5 = inlined_call_operand.vmem [shape: f32[1,16], index: 5, kind: input, shape index: {}]   ;;  %s2513_s6 = inlined_call_operand.hbm [shape: bf16[2,16,48], index: 6, kind: input, shape index: {}]   ;;  %s2514_s7 = inlined_call_operand.hbm [shape: f32[1,16], index: 7, kind: input, shape index: {}]   ;;  %s2515_s8 = inlined_call_operand.vmem [shape: f32[2,32], index: 8, kind: output, shape index: {}]  }
   0x1   :  { %2536 = sst [smem:[#allocation23_spill]] %s2509_s2 }
   0x2   :  { %2537 = sst [smem:[#allocation24_spill]] %s2513_s6 }
   0x3   :  { %2538 = sst [smem:[#allocation25_spill]] %s2514_s7 }
   0x4   :  { %13 = vsyncpa [#allocation4], 0 }
   0x5   :  { %15 = vsyncpa [#allocation4 + $0x1], 0 }
   0x6   :  { %16 = vsyncpa [#allocation6], 0 }
   0x7   :  { %18 = vsyncpa [#allocation6 + $0x1], 0 }
   0x8   :  { %19 = vsyncpa [#allocation9], 0  ;;  %s1893_s27 = smov 0   ;;  %s1895_s28 = smov 0  }
   0x9   :  { %s1897_s29 = smov 0   ;;  %s1899_s30 = smov 0  }
   0xa   :  { %s1901_s9 = smov 0   ;;  %s1903_s10 = smov 0  }
   0xb LB: > { %s2520_s11 = sadd.s32 4294967295, %s1836_s10   ;;  %p111_p0 = scmp.ne.s32.totalorder %s1820_s28, %s1816_s27  ;;  %s1836_s10 = sphi %s1903_s10, %s25_s10   ;;  %s1832_s9 = sphi %s1901_s9, %s2578_s9   ;;  %s1828_s30 = sphi %s1899_s30, %s2577_s30   ;;  %s1824_s29 = sphi %s1897_s29, %s2576_s29   ;;  %s1820_s28 = sphi %s1895_s28, %s2575_s28   ;;  %s1816_s27 = sphi %s1893_s27, %s2574_s27  }
   0xc   : > { %p1925_p1 = scmp.eq.s32.totalorder %s2520_s11, 0  ;;  %p1447_p2 = scmp.ge.s32.totalorder %s1836_s10, 1 }
   0xd   : > { %p268_p3 = scmp.lt.s32.totalorder %s1836_s10, 3  ;;  %s1838_s15 = smov [#allocation7]  }
   0xe   : > { %s2539_s12 = scalar_select %p1925_p1, 1, 0 }
   0xf   : > { %p1933_p4 = por %p1925_p1, %p111_p0  ;;  %p1937_p5 = pnand %p1447_p2, %p268_p3 }
  0x10   : > { %s311_s16 = sshll.u32 %s1838_s15, 4  ;;  %s1839_s18 = smov [#allocation8]   ;;  %s312_s16 = int_to_ptr.vmem [resolvable:$true] %s311_s16 }
  0x11   : > { %s2540_s13 = scalar_select %p1933_p4, 1, 0 }
  0x12   : > { %s2541_s14 = scalar_select %p1937_p5, 1, 0 }
  0x13   : > { %p1531_p6 = pneg %p1937_p5  ;;  %s325_s19 = sshll.u32 %s1839_s18, 4  ;;  %s1949_s19 = int_to_ptr.vmem [resolvable:$true] %s325_s19 }
  0x14   : > { %s2543_s6 = sld [smem:[#allocation24_spill]] }
  0x15   : > { %p1945_p7 = pnand %p1531_p6, %p1925_p1 }
  0x17   : > { %p1660_p9 = pneg %p1945_p7 }
  0x1a   : > { %s1658_s22 = scalar_lea.hbm %s2543_s6, 256 }
  0x1b   : > { %p1659_p8 = scmp.ne.s32.totalorder %s2543_s6, %s1658_s22  ;;  %p1665_p12 = scmp.lt.u32.totalorder %s1658_s22, %s2543_s6 }
  0x1d   : > { %p1661_p10 = pnand %p1660_p9, %p1659_p8 }
  0x1f   : > { %p1662_p11 = pneg %p1661_p10 }
  0x21   : > { %p1667_p13 = pnand %p1665_p12, %p1662_p11 }
  0x23   : > { %1670 = shalt.err (!%p1667_p13)
}
  0x24   : > { %s1671_s27 = scalar_lea.vmem %s312_s16, 256  ;;  %p1679_p6 = scmp.lt.s32.totalorder %s312_s16, %s312_s16 }
  0x25   : > { %p1672_p0 = scmp.ne.s32.totalorder %s312_s16, %s1671_s27  ;;  %p1680_p1 = scmp.lt.s32.totalorder %s1671_s27, %s1671_s27 }
  0x27   : > { %p1674_p2 = pnand %p1672_p0, %p1660_p9  ;;  %p1681_p4 = por %p1680_p1, %p1679_p6 }
  0x29   : > { %p1675_p3 = pneg %p1674_p2 }
  0x2b   : > { %p1682_p5 = pnand %p1681_p4, %p1675_p3 }
  0x2d   : > { %1685 = shalt.err (!%p1682_p5)
}
  0x2e   : > { %s2521_s15 = smov 64   ;;  %s2522_s18 = smov 4  }
  0x2f   : > { %1534 = dma.hbm_to_vmem [thread:$0]  (!%p1945_p7), %s2543_s6, 256, %s312_s16, [#allocation6], %s2521_s15, %s2521_s15, %s2522_s18  }
  0x30   : > { %s2544_s7 = sld [smem:[#allocation25_spill]] }
  0x36   : > { %s1686_s24 = scalar_lea.hbm %s2544_s7, 16 }
  0x37   : > { %p1687_p1 = scmp.ne.s32.totalorder %s2544_s7, %s1686_s24  ;;  %p1693_p8 = scmp.lt.u32.totalorder %s1686_s24, %s2544_s7 }
  0x39   : > { %p1689_p4 = pnand %p1687_p1, %p1660_p9 }
  0x3b   : > { %p1690_p5 = pneg %p1689_p4 }
  0x3d   : > { %p1695_p10 = pnand %p1693_p8, %p1690_p5 }
  0x3f   : > { %1698 = shalt.err (!%p1695_p10)
}
  0x40   : > { %s1699_s16 = scalar_lea.vmem %s1949_s19, 16  ;;  %s1706_s20 = scalar_lea.vmem %s1949_s19, 32 }
  0x41   : > { %p1700_p11 = scmp.ne.s32.totalorder %s1949_s19, %s1699_s16  ;;  %p1707_p0 = scmp.lt.s32.totalorder %s1949_s19, %s1949_s19 }
  0x42   : > { %p1708_p2 = scmp.lt.s32.totalorder %s1706_s20, %s1699_s16 }
  0x43   : > { %p1702_p12 = pnand %p1700_p11, %p1660_p9 }
  0x44   : > { %p1709_p3 = por %p1708_p2, %p1707_p0 }
  0x45   : > { %p1703_p13 = pneg %p1702_p12 }
  0x47   : > { %p1710_p6 = pnand %p1709_p3, %p1703_p13 }
  0x49   : > { %1713 = shalt.err (!%p1710_p6)
}
  0x4a   : > { %1537 = dma.hbm_to_vmem [thread:$0]  (!%p1945_p7), %s2544_s7, 16, %s1949_s19, [#allocation9]  }
  0x4b   : > { %s34_s22 = sadd.s32 1, %s1832_s9  ;;  %s98_s23 = sadd.s32 1, %s1824_s29 }
  0x4c   : > { %p35_p9 = scmp.ge.s32.totalorder %s34_s22, 2  ;;  %p105_p1 = scmp.ne.s32.totalorder %s1824_s29, %s1820_s28 }
  0x4d   : > { %p106_p4 = scmp.eq.s32.totalorder %s1836_s10, 0  ;;  %p1547_p5 = scmp.lt.s32.totalorder %s1836_s10, 2 }
  0x4e   : > { %s2580_s22 = smov (%p35_p9, %s34_s22), 0  ;;  %s2011_s17 = sand.u32 1, %s1824_s29  }
  0x4f   : > { %2545 = sst [smem:[#allocation14_spill]] %s2580_s22  ;;  %p107_p8 = por %p106_p4, %p105_p1 }
  0x50   : > { %s93_s24 = ssub.s32 %s1832_s9, %s2580_s22  ;;  %s1516_s25 = smul.u32 48, %s2011_s17 }
  0x51   : > { %p96_p10 = scmp.eq.s32.totalorder %s93_s24, 0  ;;  %s1517_s26 = smul.u32 768, %s1832_s9 }
  0x52   : > { %p2017_p7 = pnand %p1547_p5, %p107_p8  ;;  %s2547_s2 = sld [smem:[#allocation23_spill]] }
  0x53   : > { %s2022_s27 = scalar_select %p96_p10, %s1824_s29, %s98_s23  }
  0x54   : > { %s340_s21 = scalar_lea.vmem [#allocation3], %s1516_s25  ;;  %s360_s15 = sand.u32 1, %s1836_s10  }
  0x55   : > { %s350_s24 = sshll.u32 %s340_s21, 4  ;;  %s337_s18 = scalar_lea.sflag [#allocation4], %s2011_s17  ;;  %s2029_s24 = int_to_ptr.vmem [resolvable:$true] %s350_s24 }
  0x56   : > { %p1716_p12 = pneg %p2017_p7 }
  0x58   : > { %s2027_s11 = scalar_lea.hbm %s2547_s2, %s1517_s26  ;;  %s1719_s16 = scalar_lea.hbm %s2547_s2, 1536 }
  0x59   : > { %s1714_s6 = scalar_lea.hbm %s2027_s11, 768  ;;  %p1720_p2 = scmp.lt.u32.totalorder %s2027_s11, %s2547_s2 }
  0x5a   : > { %p1715_p11 = scmp.ne.s32.totalorder %s2027_s11, %s1714_s6  ;;  %p1721_p3 = scmp.lt.u32.totalorder %s1719_s16, %s1714_s6 }
  0x5b   : > { %p1723_p9 = scmp.lt.u32.totalorder %s1714_s6, %s2027_s11 }
  0x5c   : > { %p1717_p13 = pnand %p1716_p12, %p1715_p11  ;;  %p1722_p6 = por %p1721_p3, %p1720_p2 }
  0x5e   : > { %p1718_p0 = pneg %p1717_p13  ;;  %p1724_p1 = por %p1723_p9, %p1722_p6 }
  0x60   : > { %p1725_p4 = pnand %p1724_p1, %p1718_p0 }
  0x62   : > { %1728 = shalt.err (!%p1725_p4)
}
  0x63   : > { %s1729_s25 = scalar_lea.vmem %s2029_s24, 768  ;;  %s1842_s21 = smov [#allocation3]  }
  0x64   : > { %p1730_p5 = scmp.ne.s32.totalorder %s2029_s24, %s1729_s25  ;;  %s1734_s23 = sshll.u32 %s1842_s21, 4  ;;  %s1735_s23 = int_to_ptr.vmem [resolvable:$false] %s1734_s23 }
  0x65   : > { %s1736_s7 = scalar_lea.vmem %s1735_s23, 1536  ;;  %p1737_p11 = scmp.lt.s32.totalorder %s2029_s24, %s1735_s23 }
  0x66   : > { %p1732_p8 = pnand %p1730_p5, %p1716_p12  ;;  %p1738_p13 = scmp.lt.s32.totalorder %s1736_s7, %s1729_s25 }
  0x68   : > { %p1733_p10 = pneg %p1732_p8  ;;  %p1739_p2 = por %p1738_p13, %p1737_p11 }
  0x6a   : > { %p1740_p3 = pnand %p1739_p2, %p1733_p10 }
  0x6c   : > { %1743 = shalt.err (!%p1740_p3)
}
  0x6d   : > { %s2548_s6 = smov 4   ;;  %s2549_s26 = smov 64  }
  0x6e   : > { %1541 = dma.hbm_to_vmem [thread:$0]  (!%p2017_p7), %s2027_s11, 768, %s2029_s24, %s337_s18, %s2549_s26, %s2549_s26, %s2548_s6  }
  0x6f   : > { %s1455_s16 = sshll.u32 %s1832_s9, 4  ;;  %s363_s20 = scalar_lea.vmem [#allocation5], %s2011_s17 }
  0x70   : > { %s370_s25 = sshll.u32 %s363_s20, 4  ;;  %s2068_s7 = scalar_lea.hbm %s2510_s3, %s1455_s16  ;;  %s371_s25 = int_to_ptr.vmem [resolvable:$true] %s370_s25 }
  0x71   : > { %s361_s2 = scalar_lea.sflag [#allocation6], %s360_s15  ;;  %s1744_s22 = scalar_lea.hbm %s2068_s7, 16 }
  0x72   : > { %p1745_p0 = scmp.ne.s32.totalorder %s2068_s7, %s1744_s22  ;;  %s1749_s11 = scalar_lea.hbm %s2510_s3, 32 }
  0x73   : > { %p1750_p1 = scmp.lt.u32.totalorder %s2068_s7, %s2510_s3  ;;  %p1751_p4 = scmp.lt.u32.totalorder %s1749_s11, %s1744_s22 }
  0x74   : > { %p1747_p6 = pnand %p1745_p0, %p1716_p12  ;;  %p1753_p8 = scmp.lt.u32.totalorder %s1744_s22, %s2068_s7 }
  0x75   : > { %p1752_p5 = por %p1751_p4, %p1750_p1 }
  0x76   : > { %p1748_p9 = pneg %p1747_p6 }
  0x77   : > { %p1754_p10 = por %p1753_p8, %p1752_p5 }
  0x79   : > { %p1755_p11 = pnand %p1754_p10, %p1748_p9 }
  0x7b   : > { %1758 = shalt.err (!%p1755_p11)
}
  0x7c   : > { %s1759_s15 = scalar_lea.vmem %s371_s25, 16  ;;  %s1843_s26 = smov [#allocation5]  }
  0x7d   : > { %p1760_p13 = scmp.ne.s32.totalorder %s371_s25, %s1759_s15  ;;  %s1764_s16 = sshll.u32 %s1843_s26, 4  ;;  %s1765_s16 = int_to_ptr.vmem [resolvable:$false] %s1764_s16 }
  0x7e   : > { %s1766_s20 = scalar_lea.vmem %s1765_s16, 32  ;;  %p1767_p0 = scmp.lt.s32.totalorder %s371_s25, %s1765_s16 }
  0x7f   : > { %p1762_p2 = pnand %p1760_p13, %p1716_p12  ;;  %p1768_p6 = scmp.lt.s32.totalorder %s1766_s20, %s1759_s15 }
  0x81   : > { %p1763_p3 = pneg %p1762_p2  ;;  %p1769_p1 = por %p1768_p6, %p1767_p0 }
  0x83   : > { %p1770_p4 = pnand %p1769_p1, %p1763_p3 }
  0x85   : > { %1773 = shalt.err (!%p1770_p4)
}
  0x86   : > { %1544 = dma.hbm_to_vmem [thread:$0]  (!%p2017_p7), %s2068_s7, 16, %s371_s25, %s361_s2  }
  0x87   : > { %p2550_p9 = scmp.ne.s32.totalorder %s2541_s14, 0 }
  0x89   : > { %379 = sbr.rel (%p2550_p9) target bundleno = 1008 (0x3f0), region = 52 }
  0x90   : > { %s2094_s22 = sand.u32 1, %s1820_s28   ;;  %p2551_p12 = scmp.ne.s32.totalorder %s2540_s13, 0 }
  0x91   : > { %s1518_s21 = smul.u32 48, %s2094_s22  ;;  %s382_s23 = scalar_lea.sflag [#allocation4], %s2094_s22 }
  0x93   : > { %s2098_s18 = scalar_lea.vmem [#allocation3], %s1518_s21 }
  0x94   : > { %1799 = dma.done.wait (%p2551_p12), %s382_s23, 768  }
  0x95   : > { %1801 = vsyncadd (%p2551_p12), %s382_s23, 4294966528  ;;  %s2552_s2 = sadd.s32 4294967295, %s1836_s10   ;;  %s393_s25 = scalar_lea.vmem [#allocation5], %s2094_s22 }
  0x96   : > { %s390_s14 = sand.u32 1, %s2552_s2  }
  0x97   : > { %s391_s19 = scalar_lea.sflag [#allocation6], %s390_s14 }
  0x98   : > { %1803 = dma.done.wait (%p2551_p12), %s391_s19, 16  }
  0x99   : > { %1805 = vsyncadd (%p2551_p12), %s391_s19, 4294967280  ;;  %p2553_p7 = scmp.ne.s32.totalorder %s2539_s12, 0 }
  0x9b   : > { %1807 = dma.done.wait (%p2553_p7), [#allocation6], 256  }
  0x9c   : > { %1809 = vsyncadd (%p2553_p7), [#allocation6], 4294967040 }
  0x9d   : > { %1811 = dma.done.wait (%p2553_p7), [#allocation9], 16  }
  0x9e   : > { %1813 = vsyncadd (%p2553_p7), [#allocation9], 4294967280  ;;  %p1459_p5 = scmp.ne.s32.totalorder %s1828_s30, 0 }
  0x9f   : > { %v477_v0 = vld [vmem:[%s2508_s1] sm:$0x3] (!%p1459_p5)  ;;  %s1844_s13 = smov (!%p1459_p5), 16   ;;  %vm482_vm0 = vcmask (!%p1459_p5), 130048   ;;  %vm484_vm1 = vcmask (!%p1459_p5), 386048  }
  0xa0   : > { %475 = sbr.rel (%p1459_p5) target bundleno = 277 (0x115), region = 72  ;;  %479 = vrot.lane.b32.xlu0 (!%p1459_p5), %v477_v0, %s1844_s13  ;;  %v476_v1 = vld [vmem:[%s2507_s0] sm:$0x3] (!%p1459_p5) }
 0x112   : > { %v480_v2 = vpop.permute.xlu0 %479 }
 0x113   : > { %v483_v3 = vsel %vm482_vm0, %v476_v1, %v480_v2 }
 0x114   : > { %485 = vst.msk [vmem:[#allocation2] sm:$0x3] %vm484_vm1, %v483_v3 }
 0x115 PF: > { %v2524_v4 = vlaneseq  ;;  %v1845_v6 = vmov 1966171168   ;;  %v1511_v9 = vld [vmem:[%s2098_s18 + $0x18] sm:$0xff]   ;;  %v1470_v12 = vld [vmem:[%s2098_s18] sm:$0xff]   ;;  %v1509_v22 = vld [vmem:[%s2098_s18 + $0x8] sm:$0xff]   ;;  %vm556_vm2 = vcmask 392192  }
 0x116   : > { %v509_v7 = vunpack.c.l.s4 %v1845_v6  ;;  %v1483_v15 = vunpack.c.l.bf16 %v1511_v9  ;;  %v1484_v16 = vunpack.c.h.bf16 %v1511_v9  ;;  %v1471_v18 = vunpack.c.l.bf16 %v1470_v12  ;;  %v1512_v21 = vld [vmem:[%s2098_s18 + $0x20] sm:$0xff]   ;;  %v1513_v39 = vld [vmem:[%s2098_s18 + $0x28] sm:$0xff]   ;;  %v1510_v40 = vld [vmem:[%s2098_s18 + $0x10] sm:$0xff]   ;;  %p1462_p8 = scmp.ne.s32.totalorder %s1828_s30, 1 }
 0x117   : > { %v2127_v8 = vshrl.u32 %v2524_v4, 7  ;;  %v1472_v20 = vunpack.c.h.bf16 %v1470_v12  ;;  %v1487_v25 = vunpack.c.l.bf16 %v1512_v21  ;;  %v1475_v26 = vunpack.c.l.bf16 %v1509_v22  ;;  %v1461_v59 = vld [vmem:[%s393_s25] ss:$0 sm:$0xff] }
 0x118   : > { %v510_v11 = vunpack.c.0.s8 %v509_v7  ;;  %v1488_v33 = vunpack.c.h.bf16 %v1512_v21  ;;  %v1476_v34 = vunpack.c.h.bf16 %v1509_v22  ;;  %v1491_v41 = vunpack.c.l.bf16 %v1513_v39 }
 0x119   : > { %2554 = vst [vmem:[#allocation15_spill] sm:$0xff] %v2127_v8  ;;  %v2135_v14 = vsub.s32 0, %v2127_v8  ;;  %v1479_v42 = vunpack.c.l.bf16 %v1510_v40  ;;  %v1492_v47 = vunpack.c.h.bf16 %v1513_v39  ;;  %v1480_v48 = vunpack.c.h.bf16 %v1510_v40 }
 0x11a   : > { %v2132_v13 = vsub.s32 %v510_v11, %v2127_v8  ;;  %v1846_v60 = vmov 0   ;;  %vm1030_vm15 = vcmask 195712   ;;  %vm1023_vm0 = vcmask 130112  }
 0x11b   : > { %v1460_v5 = vld.sshfl [vmem:[#allocation2] sm:$0x11 pattern:$0x75316420]  ;;  %2556 = vst [vmem:[#allocation17_spill] sm:$0xff] %v2135_v14  ;;  %1607 = vset.pattern.permute.xlu1 %v1846_v60  ;;  %1606 = vset.pattern.permute.xlu0 %v1846_v60  ;;  %vm1037_vm1 = vcmask 261312  }
 0x11c   : > { %v507_v10 = vcombine.high %v1460_v5, %v1460_v5  ;;  %2555 = vst [vmem:[#allocation16_spill] sm:$0xff] %v2132_v13  ;;  %v514_v19 = vrot.slane %v1460_v5, %v2132_v13 }
 0x11e   : > { %v521_v17 = vrot.slane %v507_v10, %v2132_v13  ;;  %v537_v24 = vrot.slane %v514_v19, %v2135_v14 }
 0x120   : > { %v541_v23 = vrot.slane %v521_v17, %v2135_v14  ;;  %v544_v28 = vmul.f32 %v1471_v18, %v537_v24  ;;  %v545_v30 = vmul.f32 %v1472_v20, %v537_v24  ;;  %v546_v38 = vmul.f32 %v1475_v26, %v537_v24 }
 0x121   : > { %v547_v46 = vmul.f32 %v1476_v34, %v537_v24  ;;  %v548_v52 = vmul.f32 %v1479_v42, %v537_v24  ;;  %v549_v56 = vmul.f32 %v1480_v48, %v537_v24 }
 0x122   : > { %v550_v27 = vmul.f32 %v1483_v15, %v541_v23  ;;  %v551_v29 = vmul.f32 %v1484_v16, %v541_v23  ;;  %v557_v32 = vsel %vm556_vm2, %v544_v28, 0.0  ;;  %v560_v36 = vsel %vm556_vm2, %v545_v30, 0.0 }
 0x123   : > { %558 = vadd.xlane.f32.xlu0 %v557_v32  ;;  %v552_v37 = vmul.f32 %v1487_v25, %v541_v23  ;;  %v563_v44 = vsel %vm556_vm2, %v546_v38, 0.0  ;;  %v553_v45 = vmul.f32 %v1488_v33, %v541_v23  ;;  %v566_v50 = vsel %vm556_vm2, %v547_v46, 0.0 }
 0x124   : > { %v575_v31 = vsel %vm556_vm2, %v550_v27, 0.0  ;;  %v578_v35 = vsel %vm556_vm2, %v551_v29, 0.0  ;;  %v554_v51 = vmul.f32 %v1491_v41, %v541_v23  ;;  %v569_v54 = vsel %vm556_vm2, %v548_v52, 0.0 }
 0x125   : > { %576 = vadd.xlane.f32.xlu1 %v575_v31  ;;  %v581_v43 = vsel %vm556_vm2, %v552_v37, 0.0  ;;  %v584_v49 = vsel %vm556_vm2, %v553_v45, 0.0  ;;  %v555_v55 = vmul.f32 %v1492_v47, %v541_v23  ;;  %v572_v58 = vsel %vm556_vm2, %v549_v56, 0.0 }
 0x126   : > { %v587_v53 = vsel %vm556_vm2, %v554_v51, 0.0 }
 0x127   : > { %561 = vadd.xlane.f32.xlu0 %v560_v36  ;;  %v590_v57 = vsel %vm556_vm2, %v555_v55, 0.0 }
 0x129   : > { %579 = vadd.xlane.f32.xlu1 %v578_v35 }
 0x12b   : > { %564 = vadd.xlane.f32.xlu0 %v563_v44 }
 0x12d   : > { %582 = vadd.xlane.f32.xlu1 %v581_v43 }
 0x12f   : > { %567 = vadd.xlane.f32.xlu0 %v566_v50 }
 0x131   : > { %585 = vadd.xlane.f32.xlu1 %v584_v49 }
 0x133   : > { %570 = vadd.xlane.f32.xlu0 %v569_v54 }
 0x135   : > { %588 = vadd.xlane.f32.xlu1 %v587_v53 }
 0x137   : > { %573 = vadd.xlane.f32.xlu0 %v572_v58 }
 0x139   : > { %591 = vadd.xlane.f32.xlu1 %v590_v57 }
 0x14a   : > { %604 = vbcast.lane.b32.xlu1 %v1461_v59, 264 }
 0x14d   : > { %600 = vbcast.lane.b32.xlu0 %v1461_v59, 256 }
 0x14e   : > { %608 = vbcast.lane.b32.xlu1 %v1461_v59, 272 }
 0x151   : > { %616 = vbcast.lane.b32.xlu0 %v1461_v59, 288 }
 0x152   : > { %612 = vbcast.lane.b32.xlu1 %v1461_v59, 280 }
 0x156   : > { %620 = vbcast.lane.b32.xlu1 %v1461_v59, 296 }
 0x1b0   : > { %v559_v62 = vpop.xlane.xlu0 %558 }
 0x1b2   : > { %v577_v61 = vpop.xlane.xlu1 %576 }
 0x1b4   : > { %v562_v0 = vpop.xlane.xlu0 %561 }
 0x1b6   : > { %v580_v63 = vpop.xlane.xlu1 %579 }
 0x1b8   : > { %v565_v2 = vpop.xlane.xlu0 %564 }
 0x1ba   : > { %v583_v1 = vpop.xlane.xlu1 %582 }
 0x1bc   : > { %v2161_v5 = vpop.xlane.xlu0 %567 }
 0x1be   : > { %v2159_v3 = vpop.xlane.xlu1 %585 }
 0x1c0   : > { %v571_v7 = vpop.xlane.xlu0 %570 }
 0x1c2   : > { %v589_v6 = vpop.xlane.xlu1 %588 }
 0x1c4   : > { %v2165_v10 = vpop.xlane.xlu0 %573 }
 0x1c6   : > { %v2163_v9 = vpop.xlane.xlu1 %591 }
 0x1c8   : > { %v601_v12 = vpop.permute.xlu0 %600 }
 0x1c9   : > { %v2167_v17 = vadd.f32 %v601_v12, %v559_v62  ;;  %v2169_v18 = vadd.f32 %v601_v12, %v577_v61 }
 0x1ca   : > { %v605_v11 = vpop.permute.xlu1 %604 }
 0x1cb   : > { %v629_v15 = vadd.f32 %v605_v11, %v562_v0  ;;  %v635_v16 = vadd.f32 %v605_v11, %v580_v63  ;;  %v2176_v21 = vmul.f32 0.70710677, %v2167_v17  ;;  %v2179_v22 = vmul.f32 0.70710677, %v2169_v18 }
 0x1cc   : > { %v617_v32 = vpop.permute.xlu0 %616 }
 0x1cd   : > { %v2171_v19 = vmul.f32 0.70710677, %v629_v15  ;;  %v2173_v20 = vmul.f32 0.70710677, %v635_v16  ;;  %v664_v26 = vand.u32 2147483647, %v2176_v21  ;;  %v2192_v43 = vadd.f32 %v617_v32, %v571_v7 }
 0x1ce   : > { %v670_v28 = vand.u32 2147483647, %v2179_v22  ;;  %v609_v29 = vpop.permute.xlu1 %608  ;;  %v2197_v46 = vadd.f32 %v617_v32, %v589_v6  ;;  %v2211_v7 = vmul.f32 0.5, %v635_v16  ;;  %vm904_vm4 = vcmp.lt.f32.partialorder %v2176_v21, 0.0 }
 0x1cf   : > { %v665_v23 = vand.u32 2147483647, %v2171_v19  ;;  %v671_v24 = vand.u32 2147483647, %v2173_v20  ;;  %v676_v34 = vmul.f32 0.3275911, %v664_v26  ;;  %v2185_v36 = vadd.f32 %v609_v29, %v565_v2 }
 0x1d0   : > { %v832_v35 = vsub.f32 0.0, %v664_v26  ;;  %v682_v38 = vmul.f32 0.3275911, %v670_v28  ;;  %v838_v39 = vsub.f32 0.0, %v670_v28  ;;  %v2187_v40 = vadd.f32 %v609_v29, %v583_v1  ;;  %2557 = vst [vmem:[#allocation18_spill] sm:$0xff] %v2192_v43 }
 0x1d1   : > { %v833_v25 = vsub.f32 0.0, %v665_v23  ;;  %v839_v27 = vsub.f32 0.0, %v671_v24  ;;  %v677_v30 = vmul.f32 0.3275911, %v665_v23  ;;  %v683_v31 = vmul.f32 0.3275911, %v671_v24 }
 0x1d2   : > { %v2190_v42 = vmul.f32 0.70710677, %v2185_v36  ;;  %v2195_v45 = vmul.f32 0.70710677, %v2187_v40  ;;  %v688_v48 = vadd.f32 1.0, %v676_v34  ;;  %v844_v49 = vmul.f32 %v832_v35, %v664_v26  ;;  %v613_v61 = vpop.permute.xlu1 %612 }
 0x1d3   : > { %v845_v33 = vmul.f32 %v833_v25, %v665_v23  ;;  %v851_v37 = vmul.f32 %v839_v27, %v671_v24  ;;  %v689_v41 = vadd.f32 1.0, %v677_v30  ;;  %v695_v44 = vadd.f32 1.0, %v683_v31 }
 0x1d4   : > { %v666_v50 = vand.u32 2147483647, %v2190_v42  ;;  %v694_v52 = vadd.f32 1.0, %v682_v38  ;;  %v850_v53 = vmul.f32 %v838_v39, %v670_v28  ;;  %v672_v54 = vand.u32 2147483647, %v2195_v45 }
 0x1d5   : > { %v858_v47 = vmul.f32 1.442695, %v845_v33  ;;  %v870_v51 = vmul.f32 1.442695, %v851_v37  ;;  %1608 = vrcp.f32 %v689_v41  ;;  %v2202_v57 = vmul.f32 0.70710677, %v2192_v43 }
 0x1d6   : > { %v678_v55 = vmul.f32 0.3275911, %v666_v50  ;;  %v834_v56 = vsub.f32 0.0, %v666_v50  ;;  %1610 = vrcp.f32 %v695_v44  ;;  %v684_v58 = vmul.f32 0.3275911, %v672_v54  ;;  %v621_v16 = vpop.permute.xlu1 %620 }
 0x1d7   : > { %v840_v59 = vsub.f32 0.0, %v672_v54  ;;  %v2205_v60 = vmul.f32 0.70710677, %v2197_v46  ;;  %1612 = vpow2.f32 %v858_v47  ;;  %v856_v62 = vmul.f32 1.442695, %v844_v49 }
 0x1d8   : > { %v846_v63 = vmul.f32 %v834_v56, %v666_v50  ;;  %v668_v0 = vand.u32 2147483647, %v2202_v57  ;;  %v2208_v1 = vmul.f32 0.5, %v629_v15  ;;  %1614 = vpow2.f32 %v870_v51 }
 0x1d9   : > { %v868_v2 = vmul.f32 1.442695, %v850_v53  ;;  %v674_v6 = vand.u32 2147483647, %v2205_v60  ;;  %1616 = vrcp.f32 %v688_v48  ;;  %v690_v11 = vadd.f32 1.0, %v678_v55 }
 0x1da   : > { %v680_v12 = vmul.f32 0.3275911, %v668_v0  ;;  %1618 = vrcp.f32 %v694_v52  ;;  %v696_v23 = vadd.f32 1.0, %v684_v58  ;;  %v852_v24 = vmul.f32 %v840_v59, %v672_v54 }
 0x1db   : > { %v686_v25 = vmul.f32 0.3275911, %v674_v6  ;;  %1620 = vpow2.f32 %v856_v62  ;;  %v860_v26 = vmul.f32 1.442695, %v846_v63  ;;  %v836_v27 = vsub.f32 0.0, %v668_v0 }
 0x1dc   : > { %v631_v28 = vadd.f32 %v613_v61, %v2161_v5  ;;  %1622 = vpow2.f32 %v868_v2  ;;  %v842_v29 = vsub.f32 0.0, %v674_v6  ;;  %v2215_v30 = vadd.f32 %v613_v61, %v2159_v3 }
 0x1dd   : > { %v698_v15 = vadd.f32 1.0, %v686_v25  ;;  %v2218_v31 = vmul.f32 0.5, %v2167_v17  ;;  %1624 = vrcp.f32 %v690_v11  ;;  %v692_v32 = vadd.f32 1.0, %v680_v12 }
 0x1de   : > { %v2220_v33 = vmul.f32 0.70710677, %v631_v28  ;;  %v2223_v34 = vmul.f32 0.5, %v2169_v18  ;;  %1626 = vrcp.f32 %v696_v23  ;;  %v872_v35 = vmul.f32 1.442695, %v852_v24 }
 0x1df   : > { %v2226_v5 = vmul.f32 0.70710677, %v2215_v30  ;;  %v2228_v37 = vpop.eup %1608  ;;  %1628 = vpow2.f32 %v860_v26  ;;  %v848_v3 = vmul.f32 %v836_v27, %v668_v0  ;;  %v2232_v17 = vadd.f32 %v621_v16, %v2165_v10 }
 0x1e0   : > { %v667_v38 = vand.u32 2147483647, %v2220_v33  ;;  %v2234_v39 = vpop.eup %1610  ;;  %1630 = vrcp.f32 %v698_v15  ;;  %v854_v41 = vmul.f32 %v842_v29, %v674_v6  ;;  %v2238_v44 = vadd.f32 %v621_v16, %v2163_v9 }
 0x1e1   : > { %2558 = vst [vmem:[#allocation19_spill] sm:$0xff] %v2232_v17  ;;  %v673_v18 = vand.u32 2147483647, %v2226_v5  ;;  %v2240_v47 = vpop.eup %1612  ;;  %1632 = vrcp.f32 %v692_v32  ;;  %v2243_v50 = vmul.f32 0.70710677, %v2232_v17  ;;  %v2261_v6 = vmul.f32 0.5, %v2185_v36 }
 0x1e2   : > { %2559 = vst [vmem:[#allocation20_spill] sm:$0xff] %v2238_v44  ;;  %v679_v48 = vmul.f32 0.3275911, %v667_v38  ;;  %v835_v49 = vsub.f32 0.0, %v667_v38  ;;  %v2245_v51 = vpop.eup %1614  ;;  %1634 = vpow2.f32 %v872_v35  ;;  %v2248_v53 = vmul.f32 0.70710677, %v2238_v44 }
 0x1e3   : > { %2560 = vst [vmem:[#allocation21_spill] sm:$0xff] %v2243_v50  ;;  %v685_v10 = vmul.f32 0.3275911, %v673_v18  ;;  %v841_v52 = vsub.f32 0.0, %v673_v18  ;;  %v2250_v54 = vpop.eup %1616  ;;  %v864_v9 = vmul.f32 1.442695, %v848_v3 }
 0x1e4   : > { %2561 = vst [vmem:[#allocation22_spill] sm:$0xff] %v2248_v53  ;;  %v691_v55 = vadd.f32 1.0, %v679_v48  ;;  %v847_v56 = vmul.f32 %v835_v49, %v667_v38  ;;  %v669_v58 = vand.u32 2147483647, %v2243_v50  ;;  %v2253_v59 = vpop.eup %1618  ;;  %v876_v61 = vmul.f32 1.442695, %v854_v41 }
 0x1e5   : > { %v697_v62 = vadd.f32 1.0, %v685_v10  ;;  %v853_v63 = vmul.f32 %v841_v52, %v673_v18  ;;  %v2256_v0 = vand.u32 2147483647, %v2248_v53  ;;  %v2258_v2 = vpop.eup %1620  ;;  %v2269_v15 = vmul.f32 0.5, %v2187_v40 }
 0x1e6   : > { %1636 = vrcp.f32 %v691_v55  ;;  %v862_v11 = vmul.f32 1.442695, %v847_v56  ;;  %v681_v12 = vmul.f32 0.3275911, %v669_v58  ;;  %v2263_v23 = vpop.eup %1622  ;;  %v837_v26 = vsub.f32 0.0, %v669_v58 }
 0x1e7   : > { %1638 = vrcp.f32 %v697_v62  ;;  %v874_v24 = vmul.f32 1.442695, %v853_v63  ;;  %v687_v25 = vmul.f32 0.3275911, %v2256_v0  ;;  %v2266_v27 = vpop.eup %1624  ;;  %v725_v36 = vmul.f32 1.0614054, %v2228_v37 }
 0x1e8   : > { %1640 = vpow2.f32 %v864_v9  ;;  %v693_v29 = vadd.f32 1.0, %v681_v12  ;;  %v2272_v16 = vpop.eup %1626  ;;  %v2274_v32 = vmul.f32 0.5, %v631_v28  ;;  %v724_v3 = vmul.f32 1.0614054, %v2250_v54 }
 0x1e9   : > { %1642 = vpow2.f32 %v876_v61  ;;  %v699_v35 = vadd.f32 1.0, %v687_v25  ;;  %v2277_v38 = vpop.eup %1628  ;;  %v737_v18 = vadd.f32 -1.4531521, %v725_v36  ;;  %v730_v40 = vmul.f32 1.0614054, %v2253_v59 }
 0x1ea   : > { %1644 = vpow2.f32 %v862_v11  ;;  %v2281_v48 = vpop.eup %1630  ;;  %v2283_v49 = vmul.f32 %v837_v26, %v669_v58  ;;  %v736_v10 = vadd.f32 -1.4531521, %v724_v3  ;;  %v731_v28 = vmul.f32 1.0614054, %v2234_v39 }
 0x1eb   : > { %1646 = vpow2.f32 %v874_v24  ;;  %v2286_v52 = vpop.eup %1632  ;;  %v749_v9 = vmul.f32 %v2228_v37, %v737_v18  ;;  %v742_v55 = vadd.f32 -1.4531521, %v730_v40  ;;  %v726_v56 = vmul.f32 1.0614054, %v2266_v27 }
 0x1ec   : > { %1648 = vrcp.f32 %v693_v29  ;;  %v2290_v61 = vpop.eup %1634  ;;  %v748_v62 = vmul.f32 %v2250_v54, %v736_v10  ;;  %v743_v63 = vadd.f32 -1.4531521, %v731_v28  ;;  %v732_v58 = vmul.f32 1.0614054, %v2272_v16 }
 0x1ed   : > { %1650 = vrcp.f32 %v699_v35  ;;  %v761_v11 = vadd.f32 1.4214138, %v749_v9  ;;  %v754_v12 = vmul.f32 %v2253_v59, %v742_v55  ;;  %v738_v24 = vadd.f32 -1.4531521, %v726_v56 }
 0x1ee   : > { %v734_v25 = vmul.f32 1.0614054, %v2281_v48  ;;  %v760_v26 = vadd.f32 1.4214138, %v748_v62  ;;  %v755_v29 = vmul.f32 %v2234_v39, %v743_v63  ;;  %v744_v36 = vadd.f32 -1.4531521, %v732_v58 }
 0x1ef   : > { %v2298_v3 = vmul.f32 1.0614054, %v2286_v52  ;;  %v773_v35 = vmul.f32 %v2228_v37, %v761_v11  ;;  %v766_v40 = vadd.f32 1.4214138, %v754_v12  ;;  %v750_v10 = vmul.f32 %v2266_v27, %v738_v24 }
 0x1f0   : > { %v2300_v18 = vpop.eup %1636  ;;  %v2304_v28 = vadd.f32 -1.4531521, %v734_v25  ;;  %v772_v55 = vmul.f32 %v2250_v54, %v760_v26  ;;  %v767_v56 = vadd.f32 1.4214138, %v755_v29  ;;  %v756_v62 = vmul.f32 %v2272_v16, %v744_v36 }
 0x1f1   : > { %v2306_v9 = vpop.eup %1638  ;;  %v727_v63 = vmul.f32 1.0614054, %v2300_v18  ;;  %v785_v4 = vadd.f32 -0.28449672, %v773_v35  ;;  %v778_v41 = vmul.f32 %v2253_v59, %v766_v40  ;;  %v762_v11 = vadd.f32 1.4214138, %v750_v10 }
 0x1f2   : > { %v2311_v58 = vpop.eup %1640  ;;  %v733_v12 = vmul.f32 1.0614054, %v2306_v9  ;;  %v784_v25 = vadd.f32 -0.28449672, %v772_v55  ;;  %v779_v14 = vmul.f32 %v2234_v39, %v767_v56  ;;  %v768_v13 = vadd.f32 1.4214138, %v756_v62 }
 0x1f3   : > { %v2315_v24 = vpop.eup %1642  ;;  %v739_v26 = vadd.f32 -1.4531521, %v727_v63  ;;  %v797_v36 = vmul.f32 %v2228_v37, %v785_v4  ;;  %v790_v8 = vadd.f32 -0.28449672, %v778_v41  ;;  %v774_v17 = vmul.f32 %v2266_v27, %v762_v11 }
 0x1f4   : > { %v2318_v29 = vpop.eup %1644  ;;  %v745_v35 = vadd.f32 -1.4531521, %v733_v12  ;;  %v796_v40 = vmul.f32 %v2250_v54, %v784_v25  ;;  %v791_v10 = vadd.f32 -0.28449672, %v779_v14  ;;  %v780_v50 = vmul.f32 %v2272_v16, %v768_v13 }
 0x1f5   : > { %v2322_v44 = vpop.eup %1646  ;;  %v751_v55 = vmul.f32 %v2300_v18, %v739_v26  ;;  %v809_v62 = vadd.f32 0.2548296, %v797_v36  ;;  %v802_v63 = vmul.f32 %v2253_v59, %v790_v8  ;;  %v786_v53 = vadd.f32 -0.28449672, %v774_v17 }
 0x1f6   : > { %v2327_v56 = vpop.eup %1648  ;;  %v757_v4 = vmul.f32 %v2306_v9, %v745_v35  ;;  %vm905_vm3 = vcmp.lt.f32.partialorder %v2171_v19, 0.0  ;;  %v808_v11 = vadd.f32 0.2548296, %v796_v40  ;;  %v803_v12 = vmul.f32 %v2234_v39, %v791_v10 }
 0x1f7   : > { %v2331_v41 = vpop.eup %1650  ;;  %v792_v14 = vadd.f32 -0.28449672, %v780_v50  ;;  %v763_v25 = vadd.f32 1.4214138, %v751_v55  ;;  %v821_v13 = vmul.f32 %v2228_v37, %v809_v62  ;;  %v814_v26 = vadd.f32 0.2548296, %v802_v63 }
 0x1f8   : > { %v798_v36 = vmul.f32 %v2266_v27, %v786_v53  ;;  %v769_v8 = vadd.f32 1.4214138, %v757_v4  ;;  %vm910_vm5 = vcmp.lt.f32.partialorder %v2179_v22, 0.0  ;;  %v820_v17 = vmul.f32 %v2250_v54, %v808_v11 }
 0x1f9   : > { %v815_v35 = vadd.f32 0.2548296, %v803_v12  ;;  %v804_v43 = vmul.f32 %v2272_v16, %v792_v14  ;;  %v775_v40 = vmul.f32 %v2300_v18, %v763_v25  ;;  %vm911_vm6 = vcmp.lt.f32.partialorder %v2173_v20, 0.0 }
 0x1fa   : > { %v881_v50 = vmul.f32 %v2240_v47, %v821_v13  ;;  %v826_v10 = vmul.f32 %v2253_v59, %v814_v26  ;;  %v810_v37 = vadd.f32 0.2548296, %v798_v36  ;;  %v781_v55 = vmul.f32 %v2306_v9, %v769_v8 }
 0x1fb   : > { %vm906_vm7 = vcmp.lt.f32.partialorder %v2190_v42, 0.0  ;;  %v880_v53 = vmul.f32 %v2258_v2, %v820_v17  ;;  %v827_v54 = vmul.f32 %v2234_v39, %v815_v35  ;;  %v816_v62 = vadd.f32 0.2548296, %v804_v43 }
 0x1fc   : > { %v787_v63 = vadd.f32 -0.28449672, %v775_v40  ;;  %vm912_vm8 = vcmp.lt.f32.partialorder %v2195_v45, 0.0  ;;  %v893_v4 = vsub.f32 1.0, %v881_v50  ;;  %v886_v11 = vmul.f32 %v2263_v23, %v826_v10 }
 0x1fd   : > { %v822_v47 = vmul.f32 %v2266_v27, %v810_v37  ;;  %v793_v12 = vadd.f32 -0.28449672, %v781_v55  ;;  %v892_v59 = vsub.f32 1.0, %v880_v53  ;;  %v887_v14 = vmul.f32 %v2245_v51, %v827_v54 }
 0x1fe   : > { %v828_v25 = vmul.f32 %v2272_v16, %v816_v62  ;;  %v799_v13 = vmul.f32 %v2300_v18, %v787_v63  ;;  %v917_v2 = vsub.f32 0.0, %v893_v4  ;;  %v898_v26 = vsub.f32 1.0, %v886_v11 }
 0x1ff   : > { %v882_v43 = vmul.f32 %v2277_v38, %v822_v47  ;;  %v805_v39 = vmul.f32 %v2306_v9, %v793_v12  ;;  %v916_v36 = vsub.f32 0.0, %v892_v59  ;;  %v899_v8 = vsub.f32 1.0, %v887_v14 }
 0x200   : > { %v888_v23 = vmul.f32 %v2290_v61, %v828_v25  ;;  %v811_v17 = vadd.f32 0.2548296, %v799_v13  ;;  %v929_v27 = vsel %vm905_vm3, %v917_v2, %v893_v4  ;;  %v922_v35 = vsub.f32 0.0, %v898_v26 }
 0x201   : > { %v894_v51 = vsub.f32 1.0, %v882_v43  ;;  %v817_v40 = vadd.f32 0.2548296, %v805_v39  ;;  %vm907_vm9 = vcmp.lt.f32.partialorder %v2220_v33, 0.0  ;;  %v941_v16 = vadd.f32 1.0, %v929_v27 }
 0x202   : > { %v928_v50 = vsel %vm904_vm4, %v916_v36, %v892_v59  ;;  %v923_v38 = vsub.f32 0.0, %v899_v8  ;;  %v900_v10 = vsub.f32 1.0, %v888_v23  ;;  %v934_v55 = vsel %vm910_vm5, %v922_v35, %v898_v26 }
 0x203   : > { %v940_v37 = vadd.f32 1.0, %v928_v50  ;;  %v918_v61 = vsub.f32 0.0, %v894_v51  ;;  %v823_v53 = vmul.f32 %v2300_v18, %v811_v17  ;;  %v953_v19 = vmul.f32 %v941_v16, %v2208_v1 }
 0x204   : > { %v946_v54 = vadd.f32 1.0, %v934_v55  ;;  %v935_v62 = vsel %vm911_vm6, %v923_v38, %v899_v8  ;;  %v924_v63 = vsub.f32 0.0, %v900_v10  ;;  %v2562_v22 = vsub.f32 0.0, %v2256_v0 }
 0x205   : > { %v952_v4 = vmul.f32 %v940_v37, %v2218_v31  ;;  %v947_v21 = vadd.f32 1.0, %v935_v62  ;;  %v930_v11 = vsel %vm906_vm7, %v918_v61, %v894_v51  ;;  %v883_v47 = vmul.f32 %v2318_v29, %v823_v53  ;;  %980 = vperm.xlu1 %1607, %v953_v19  }
 0x206   : > { %v855_v12 = vmul.f32 %v2562_v22, %v2256_v0  ;;  %v866_v18 = vmul.f32 1.442695, %v2283_v49  ;;  %v936_v20 = vsel %vm912_vm8, %v924_v63, %v900_v10  ;;  %v829_v1 = vmul.f32 %v2306_v9, %v817_v40 }
 0x207   : > { %977 = vperm.xlu0 %1606, %v952_v4   ;;  %v958_v31 = vmul.f32 %v946_v54, %v2223_v34  ;;  %v942_v59 = vadd.f32 1.0, %v930_v11  ;;  %v895_v42 = vsub.f32 1.0, %v883_v47  ;;  %v758_v29 = vmul.f32 %v2281_v48, %v2304_v28 }
 0x208   : > { %v959_v14 = vmul.f32 %v947_v21, %v2211_v7  ;;  %v889_v0 = vmul.f32 %v2322_v44, %v829_v1  ;;  %v740_v49 = vadd.f32 -1.4531521, %v2298_v3  ;;  %v735_v25 = vmul.f32 1.0614054, %v2331_v41 }
 0x209   : > { %v948_v45 = vadd.f32 1.0, %v936_v20  ;;  %v919_v13 = vsub.f32 0.0, %v895_v42  ;;  %v770_v2 = vadd.f32 1.4214138, %v758_v29  ;;  %v729_v9 = vmul.f32 1.0614054, %v2327_v56  ;;  %995 = vperm.xlu1 %1607, %v958_v31  }
 0x20a   : > { %v878_v26 = vmul.f32 1.442695, %v855_v12  ;;  %v901_v34 = vsub.f32 1.0, %v889_v0  ;;  %v752_v43 = vmul.f32 %v2286_v52, %v740_v49  ;;  %v747_v39 = vadd.f32 -1.4531521, %v735_v25 }
 0x20b   : > { %998 = vperm.xlu0 %1606, %v959_v14   ;;  %v954_v7 = vmul.f32 %v942_v59, %v2261_v6  ;;  %v931_v44 = vsel %vm907_vm9, %v919_v13, %v895_v42  ;;  %v782_v3 = vmul.f32 %v2281_v48, %v770_v2  ;;  %v741_v28 = vadd.f32 -1.4531521, %v729_v9  ;;  %v2563_v2 = vld [vmem:[#allocation18_spill] sm:$0xff] }
 0x20c   : > { %v943_v36 = vadd.f32 1.0, %v931_v44  ;;  %v925_v8 = vsub.f32 0.0, %v901_v34  ;;  %v764_v23 = vadd.f32 1.4214138, %v752_v43  ;;  %v759_v17 = vmul.f32 %v2331_v41, %v747_v39  ;;  %v2564_v9 = vld [vmem:[#allocation22_spill] sm:$0xff] }
 0x20d   : > { %vm913_vm10 = vcmp.lt.f32.partialorder %v2226_v5, 0.0  ;;  %v960_v27 = vmul.f32 %v948_v45, %v2269_v15  ;;  %v794_v35 = vadd.f32 -0.28449672, %v782_v3  ;;  %v753_v51 = vmul.f32 %v2327_v56, %v741_v28  ;;  %983 = vperm.xlu1 %1607, %v954_v7   ;;  %v2567_v28 = vld [vmem:[#allocation19_spill] sm:$0xff] }
 0x20e   : > { %v649_v6 = vmul.f32 0.5, %v2215_v30  ;;  %v937_v33 = vsel %vm913_vm10, %v925_v8, %v901_v34  ;;  %v776_v40 = vmul.f32 %v2286_v52, %v764_v23  ;;  %v771_v16 = vadd.f32 1.4214138, %v759_v17  ;;  %v2565_v34 = vld [vmem:[#allocation21_spill] sm:$0xff] }
 0x20f   : > { %1652 = vpow2.f32 %v878_v26  ;;  %1001 = vperm.xlu0 %1606, %v960_v27   ;;  %v949_v50 = vadd.f32 1.0, %v937_v33  ;;  %v806_v38 = vmul.f32 %v2281_v48, %v794_v35  ;;  %v765_v10 = vadd.f32 1.4214138, %v753_v51 }
 0x210   : > { %1654 = vpow2.f32 %v866_v18  ;;  %v955_v5 = vmul.f32 %v943_v36, %v2274_v32  ;;  %v788_v15 = vadd.f32 -0.28449672, %v776_v40  ;;  %v783_v37 = vmul.f32 %v2331_v41, %v771_v16 }
 0x211   : > { %v961_v55 = vmul.f32 %v949_v50, %v649_v6  ;;  %v818_v61 = vadd.f32 0.2548296, %v806_v38  ;;  %v777_v30 = vmul.f32 %v2327_v56, %v765_v10  ;;  %vm914_vm11 = vcmp.lt.f32.partialorder %v2205_v60, 0.0 }
 0x212   : > { %986 = vperm.xlu1 %1607, %v955_v5   ;;  %v800_v53 = vmul.f32 %v2286_v52, %v788_v15  ;;  %v795_v19 = vadd.f32 -0.28449672, %v783_v37  ;;  %vm908_vm12 = vcmp.lt.f32.partialorder %v2202_v57, 0.0  ;;  %vm915_vm13 = vcmp.lt.f32.partialorder %v2564_v9, 0.0  ;;  %v2569_v37 = vld [vmem:[#allocation15_spill] sm:$0xff] }
 0x213   : > { %1004 = vperm.xlu0 %1606, %v961_v55   ;;  %v830_v54 = vmul.f32 %v2281_v48, %v818_v61  ;;  %v789_v62 = vadd.f32 -0.28449672, %v777_v30  ;;  %vm909_vm14 = vcmp.lt.f32.partialorder %v2565_v34, 0.0  ;;  %v645_v36 = vmul.f32 0.5, %v2567_v28  ;;  %v2570_v34 = vld [vmem:[#allocation16_spill] sm:$0xff] (!%p1462_p8) }
 0x214   : > { %v812_v63 = vadd.f32 0.2548296, %v800_v53  ;;  %v807_v4 = vmul.f32 %v2331_v41, %v795_v19  ;;  %v2568_v33 = vlaneseq  ;;  %vm1044_vm3 = vcmask 326912  }
 0x215   : > { %v890_v32 = vmul.f32 %v2315_v24, %v830_v54  ;;  %v801_v21 = vmul.f32 %v2327_v56, %v789_v62  ;;  %vm1051_vm4 = vcmask 392512   ;;  %vm1082_vm5 = vcmask 1041409  }
 0x216   : > { %v824_v11 = vmul.f32 %v2286_v52, %v812_v63  ;;  %v819_v47 = vadd.f32 0.2548296, %v807_v4  ;;  %v650_v52 = vmul.f32 0.5, %v2197_v46  ;;  %v2566_v46 = vld [vmem:[#allocation20_spill] sm:$0xff]  ;;  %v1013_v40 = vand.u32 127, %v2568_v33 }
 0x217   : > { %v902_v22 = vsub.f32 1.0, %v890_v32  ;;  %v813_v12 = vadd.f32 0.2548296, %v801_v21  ;;  %v651_v39 = vmul.f32 0.5, %v2566_v46  ;;  %vm1085_vm6 = vcmask 386048  }
 0x218   : > { %v884_v18 = vmul.f32 %v2311_v58, %v824_v11  ;;  %v831_v20 = vmul.f32 %v2331_v41, %v819_v47  ;;  %v1025_v50 = vadd.s32 4294967280, %v1013_v40  ;;  %v1018_v38 = vadd.s32 4294967288, %v1013_v40 }
 0x219   : > { %v1653_v1 = vpop.eup %1652  ;;  %v926_v31 = vsub.f32 0.0, %v902_v22  ;;  %v825_v48 = vmul.f32 %v2327_v56, %v813_v12  ;;  %v644_v56 = vmul.f32 0.5, %v2563_v2  ;;  %v1032_v10 = vadd.s32 4294967272, %v1013_v40 }
 0x21a   : > { %v1655_v59 = vpop.eup %1654  ;;  %v896_v42 = vsub.f32 1.0, %v884_v18  ;;  %v891_v24 = vmul.f32 %v1653_v1, %v831_v20  ;;  %v1039_v15 = vadd.s32 4294967264, %v1013_v40  ;;  %v2422_v55 = vsub.s32 %v1025_v50, %v2569_v37 }
 0x21b   : > { %v938_v29 = vsel %vm914_vm11, %v926_v31, %v902_v22  ;;  %v885_v14 = vmul.f32 %v1655_v59, %v825_v48  ;;  %v2425_v30 = vsub.s32 %v1018_v38, %v2569_v37  ;;  %v2428_v53 = vsub.s32 %v1013_v40, %v2569_v37 }
 0x21c   : > { %v950_v0 = vadd.f32 1.0, %v938_v29  ;;  %v920_v49 = vsub.f32 0.0, %v896_v42  ;;  %v903_v25 = vsub.f32 1.0, %v891_v24  ;;  %v2431_v19 = vsub.s32 %v1032_v10, %v2569_v37 }
 0x21d   : > { %v897_v58 = vsub.f32 1.0, %v885_v14  ;;  %v1046_v54 = vadd.s32 4294967256, %v1013_v40  ;;  %v1042_v62 = vsub.s32 %v1039_v15, %v2569_v37  ;;  %vm1285_vm7 = vcmask (!%p1462_p8), 254976  }
 0x21e   : > { %v962_v41 = vmul.f32 %v950_v0, %v650_v52  ;;  %v932_v45 = vsel %vm908_vm12, %v920_v49, %v896_v42  ;;  %v927_v13 = vsub.f32 0.0, %v903_v25 }
 0x21f   : > { %v944_v60 = vadd.f32 1.0, %v932_v45  ;;  %v921_v26 = vsub.f32 0.0, %v897_v58  ;;  %v1049_v12 = vsub.s32 %v1046_v54, %v2569_v37 }
 0x220   : > { %1007 = vperm.xlu0 %1606, %v962_v41   ;;  %v939_v43 = vsel %vm915_vm13, %v927_v13, %v903_v25 }
 0x221   : > { %v956_v7 = vmul.f32 %v944_v60, %v644_v56  ;;  %v951_v44 = vadd.f32 1.0, %v939_v43  ;;  %v933_v3 = vsel %vm909_vm14, %v921_v26, %v897_v58  ;;  %v1502_v60 = vld [vmem:[#allocation7] sm:$0xff] (!%p1462_p8)   ;;  %v1494_v26 = vld [vmem:[%s2511_s4] sm:$0xff] (!%p1462_p8)  }
 0x222   : > { %v945_v57 = vadd.f32 1.0, %v933_v3  ;;  %v1504_v46 = vunpack.c.h.bf16 (!%p1462_p8), %v1502_v60 }
 0x223   : > { %989 = vperm.xlu1 %1607, %v956_v7   ;;  %v963_v8 = vmul.f32 %v951_v44, %v651_v39  ;;  %v1495_v39 = vunpack.c.l.bf16 (!%p1462_p8), %v1494_v26  ;;  %v1496_v7 = vunpack.c.h.bf16 (!%p1462_p8), %v1494_v26  ;;  %v1514_v44 = vld [vmem:[%s2511_s4 + $0x8] sm:$0xff] (!%p1462_p8)  }
 0x224   : > { %v957_v23 = vmul.f32 %v945_v57, %v645_v36  ;;  %v2571_v57 = vld [vmem:[#allocation17_spill] sm:$0xff] (!%p1462_p8)  ;;  %v1499_v36 = vunpack.c.l.bf16 (!%p1462_p8), %v1514_v44 }
 0x225   : > { %1010 = vperm.xlu0 %1606, %v963_v8  }
 0x227   : > { %992 = vperm.xlu1 %1607, %v957_v23   ;;  %v1503_v23 = vunpack.c.l.bf16 (!%p1462_p8), %v1502_v60 }
 0x284   : > { %v981_v27 = vpop.permute.xlu1 %980 }
 0x285   : > { %v1022_v11 = vrot.slane %v981_v27, %v2425_v30 }
 0x286   : > { %v978_v17 = vpop.permute.xlu0 %977 }
 0x287   : > { %v1017_v47 = vrot.slane %v978_v17, %v2428_v53 }
 0x288   : > { %v996_v51 = vpop.permute.xlu1 %995 }
 0x289   : > { %v1056_v63 = vrot.slane %v996_v51, %v2428_v53  ;;  %v1024_v29 = vsel %vm1023_vm0, %v1022_v11, %v1017_v47  ;;  %v1500_v51 = vunpack.c.h.bf16 (!%p1462_p8), %v1514_v44  ;;  %v1464_v11 = vld [vmem:[%s2512_s5] ss:$0 sm:$0xff] (!%p1462_p8)  ;;  %v1465_v47 = vld [vmem:[#allocation8] ss:$0 sm:$0xff] (!%p1462_p8) }
 0x28a   : > { %v999_v35 = vpop.permute.xlu0 %998 }
 0x28b   : > { %v1060_v4 = vrot.slane %v999_v35, %v2425_v30 }
 0x28c   : > { %v984_v16 = vpop.permute.xlu1 %983 }
 0x28d   : > { %v1029_v18 = vrot.slane %v984_v16, %v2422_v55  ;;  %v1061_v31 = vsel %vm1023_vm0, %v1060_v4, %v1056_v63 }
 0x28e   : > { %v1002_v6 = vpop.permute.xlu0 %1001 }
 0x28f   : > { %v1065_v21 = vrot.slane %v1002_v6, %v2422_v55  ;;  %v1031_v0 = vsel %vm1030_vm15, %v1029_v18, %v1024_v29  ;;  %v1515_v6 = vld [vmem:[#allocation7 + $0x8] sm:$0xff] (!%p1462_p8)  }
 0x290   : > { %v1507_v38 = vunpack.c.l.bf16 (!%p1462_p8), %v1515_v6  ;;  %v1508_v37 = vunpack.c.h.bf16 (!%p1462_p8), %v1515_v6 }
 0x291   : > { %v987_v61 = vpop.permute.xlu1 %986  ;;  %v1066_v59 = vsel %vm1030_vm15, %v1065_v21, %v1061_v31 }
 0x292   : > { %v1005_v5 = vpop.permute.xlu0 %1004  ;;  %v1036_v48 = vrot.slane %v987_v61, %v2431_v19 }
 0x293   : > { %v1070_v22 = vrot.slane %v1005_v5, %v2431_v19 }
 0x294   : > { %v1038_v58 = vsel %vm1037_vm1, %v1036_v48, %v1031_v0 }
 0x295   : > { %v1071_v14 = vsel %vm1037_vm1, %v1070_v22, %v1066_v59  ;;  %v1847_v22 = vmov (!%p1462_p8), 0  }
 0x296   : > { %1657 = vset.pattern.permute.xlu1 (!%p1462_p8), %v1847_v22  ;;  %1656 = vset.pattern.permute.xlu0 (!%p1462_p8), %v1847_v22 }
 0x29f   : > { %v1008_v32 = vpop.permute.xlu0 %1007 }
 0x2a0   : > { %v1075_v1 = vrot.slane %v1008_v32, %v1042_v62 }
 0x2a2   : > { %v990_v20 = vpop.permute.xlu1 %989  ;;  %v1076_v49 = vsel %vm1044_vm3, %v1075_v1, %v1071_v14 }
 0x2a3   : > { %v1043_v42 = vrot.slane %v990_v20, %v1042_v62 }
 0x2a4   : > { %v1011_v24 = vpop.permute.xlu0 %1010 }
 0x2a5   : > { %v1080_v52 = vrot.slane %v1011_v24, %v1049_v12  ;;  %v1045_v13 = vsel %vm1044_vm3, %v1043_v42, %v1038_v58  ;;  %1090 = sbr.rel (%p1462_p8) target bundleno = 1008 (0x3f0), region = 76 }
 0x2a6   : > { %v993_v25 = vpop.permute.xlu1 %992 }
 0x2a7   : > { %v1050_v41 = vrot.slane %v993_v25, %v1049_v12  ;;  %v1081_v45 = vsel %vm1051_vm4, %v1080_v52, %v1076_v49 }
 0x2a9   : > { %v1052_v2 = vsel %vm1051_vm4, %v1050_v41, %v1045_v13 }
 0x2aa   : > { %v1083_v56 = vsel %vm1082_vm5, %v1081_v45, %v1052_v2 }
 0x2ab   : > { %1086 = vst.msk [vmem:[#allocation2] sm:$0x3] %vm1085_vm6, %v1083_v56 }
 0x2b2   : > { %v1463_v9 = vld.sshfl [vmem:[#allocation2] sm:$0x11 pattern:$0x75316420] }
 0x2b3   : > { %v1111_v43 = vrot.slane %v1463_v9, %v2570_v34  ;;  %v1104_v3 = vcombine.high %v1463_v9, %v1463_v9 }
 0x2b5   : > { %v1126_v28 = vrot.slane %v1111_v43, %v2571_v57  ;;  %v1118_v8 = vrot.slane %v1104_v3, %v2570_v34 }
 0x2b7   : > { %v1177_v17 = vmul.f32 %v1504_v46, %v1126_v28  ;;  %v1133_v27 = vmul.f32 %v1495_v39, %v1126_v28  ;;  %v1134_v35 = vmul.f32 %v1496_v7, %v1126_v28  ;;  %v1130_v33 = vrot.slane %v1118_v8, %v2571_v57 }
 0x2b8   : > { %v1176_v5 = vmul.f32 %v1503_v23, %v1126_v28 }
 0x2b9   : > { %v1183_v40 = vsel %vm556_vm2, %v1177_v17, 0.0  ;;  %v1137_v16 = vsel %vm556_vm2, %v1133_v27, 0.0  ;;  %v1135_v50 = vmul.f32 %v1499_v36, %v1130_v33  ;;  %v1140_v10 = vsel %vm556_vm2, %v1134_v35, 0.0 }
 0x2ba   : > { %1184 = vadd.xlane.f32.xlu1 %v1183_v40  ;;  %1138 = vadd.xlane.f32.xlu0 %v1137_v16  ;;  %v1136_v15 = vmul.f32 %v1500_v51, %v1130_v33  ;;  %v1180_v54 = vsel %vm556_vm2, %v1176_v5, 0.0  ;;  %v1178_v63 = vmul.f32 %v1507_v38, %v1130_v33  ;;  %v1179_v4 = vmul.f32 %v1508_v37, %v1130_v33 }
 0x2bb   : > { %v1143_v61 = vsel %vm556_vm2, %v1135_v50, 0.0 }
 0x2bc   : > { %v1146_v62 = vsel %vm556_vm2, %v1136_v15, 0.0  ;;  %v1186_v32 = vsel %vm556_vm2, %v1178_v63, 0.0  ;;  %v1189_v21 = vsel %vm556_vm2, %v1179_v4, 0.0  ;;  %vm1283_vm2 = vcmask 130048  }
 0x2be   : > { %1141 = vadd.xlane.f32.xlu0 %v1140_v10  ;;  %1144 = vadd.xlane.f32.xlu1 %v1143_v61 }
 0x2c2   : > { %1181 = vadd.xlane.f32.xlu0 %v1180_v54  ;;  %1147 = vadd.xlane.f32.xlu1 %v1146_v62 }
 0x2c6   : > { %1187 = vadd.xlane.f32.xlu0 %v1186_v32  ;;  %1190 = vadd.xlane.f32.xlu1 %v1189_v21 }
 0x2d7   : > { %1160 = vbcast.lane.b32.xlu1 %v1464_v11, 264 }
 0x2db   : > { %1199 = vbcast.lane.b32.xlu1 %v1465_v47, 256 }
 0x2dc   : > { %1156 = vbcast.lane.b32.xlu0 %v1464_v11, 256 }
 0x2df   : > { %1203 = vbcast.lane.b32.xlu1 %v1465_v47, 264 }
 0x347   : > { %v1185_v12 = vpop.xlane.xlu1 %1184  ;;  %v1139_v18 = vpop.xlane.xlu0 %1138 }
 0x34b   : > { %v1142_v20 = vpop.xlane.xlu0 %1141  ;;  %v1145_v1 = vpop.xlane.xlu1 %1144 }
 0x34f   : > { %v1182_v31 = vpop.xlane.xlu0 %1181  ;;  %v1148_v48 = vpop.xlane.xlu1 %1147 }
 0x353   : > { %v1188_v59 = vpop.xlane.xlu0 %1187  ;;  %v1191_v42 = vpop.xlane.xlu1 %1190 }
 0x357   : > { %v1157_v24 = vpop.permute.xlu0 %1156  ;;  %v1161_v29 = vpop.permute.xlu1 %1160 }
 0x358   : > { %v1164_v14 = vadd.f32 %v1157_v24, %v1139_v18  ;;  %v1165_v52 = vadd.f32 %v1161_v29, %v1142_v20  ;;  %v1166_v58 = vadd.f32 %v1157_v24, %v1145_v1  ;;  %v1167_v45 = vadd.f32 %v1161_v29, %v1148_v48 }
 0x35a   : > { %1216 = vperm.xlu0 %1656, %v1164_v14   ;;  %1219 = vperm.xlu1 %1657, %v1165_v52  }
 0x35b   : > { %v1200_v0 = vpop.permute.xlu1 %1199 }
 0x35c   : > { %v1207_v49 = vadd.f32 %v1200_v0, %v1182_v31  ;;  %v1209_v13 = vadd.f32 %v1200_v0, %v1188_v59 }
 0x35e   : > { %1252 = vperm.xlu1 %1657, %v1207_v49  }
 0x35f   : > { %v1204_v25 = vpop.permute.xlu1 %1203 }
 0x360   : > { %v1208_v41 = vadd.f32 %v1204_v25, %v1185_v12  ;;  %v1210_v2 = vadd.f32 %v1204_v25, %v1191_v42 }
 0x362   : > { %1222 = vperm.xlu1 %1657, %v1166_v58   ;;  %1255 = vperm.xlu0 %1656, %v1208_v41  }
 0x366   : > { %1258 = vperm.xlu1 %1657, %v1209_v13   ;;  %1225 = vperm.xlu0 %1656, %v1167_v45  }
 0x36a   : > { %1261 = vperm.xlu0 %1656, %v1210_v2  }
 0x3d9   : > { %v1220_v56 = vpop.permute.xlu1 %1219  ;;  %v1217_v9 = vpop.permute.xlu0 %1216 }
 0x3da   : > { %v1230_v7 = vrot.slane %v1217_v9, %v2428_v53  ;;  %v1234_v44 = vrot.slane %v1220_v56, %v2425_v30 }
 0x3dc   : > { %v1235_v27 = vsel %vm1023_vm0, %v1234_v44, %v1230_v7 }
 0x3dd   : > { %v1253_v60 = vpop.permute.xlu1 %1252 }
 0x3de   : > { %v1266_v36 = vrot.slane %v1253_v60, %v2422_v55 }
 0x3e1   : > { %v1256_v26 = vpop.permute.xlu0 %1255  ;;  %v1223_v34 = vpop.permute.xlu1 %1222 }
 0x3e2   : > { %v1270_v3 = vrot.slane %v1256_v26, %v2431_v19  ;;  %v1239_v57 = vrot.slane %v1223_v34, %v2428_v53 }
 0x3e4   : > { %v1271_v35 = vsel %vm1037_vm1, %v1270_v3, %v1266_v36 }
 0x3e5   : > { %v1226_v43 = vpop.permute.xlu0 %1225  ;;  %v1259_v39 = vpop.permute.xlu1 %1258 }
 0x3e6   : > { %v1243_v46 = vrot.slane %v1226_v43, %v2425_v30  ;;  %v1275_v23 = vrot.slane %v1259_v39, %v2422_v55 }
 0x3e8   : > { %v1244_v8 = vsel %vm1023_vm0, %v1243_v46, %v1239_v57 }
 0x3e9   : > { %v1262_v28 = vpop.permute.xlu0 %1261  ;;  %v1245_v51 = vsel %vm1082_vm5, %v1244_v8, %v1235_v27 }
 0x3ea   : > { %v1279_v17 = vrot.slane %v1262_v28, %v2431_v19 }
 0x3ec   : > { %v1280_v30 = vsel %vm1037_vm1, %v1279_v17, %v1275_v23 }
 0x3ed   : > { %v1281_v53 = vsel %vm1082_vm5, %v1280_v30, %v1271_v35 }
 0x3ee   : > { %v1284_v6 = vsel %vm1283_vm2, %v1245_v51, %v1281_v53 }
 0x3ef   : > { %1286 = vst.msk [vmem:[%s2515_s8] sm:$0x3] %vm1285_vm7, %v1284_v6 }
 0x3f0 PF: > { %s25_s10 = sadd.s32 1, %s1836_s10   ;;  %s2572_s21 = smov %s2022_s27 }
 0x3f1   : > { %p22_p10 = scmp.ge.s32.totalorder %s25_s10, 4   ;;  %s2573_s23 = sld [smem:[#allocation14_spill]] }
 0x3f2   : > { %s2574_s27 = smov %s1820_s28  ;;  %s2575_s28 = smov %s1824_s29 }
 0x3f3   : > { %s2576_s29 = smov %s2572_s21  ;;  %s2577_s30 = smov %s1832_s9 }
 0x3f4   :  { %24 = sbr.rel (!%p22_p10) target bundleno = 11 (0xb), region = 131 }
 0x3f7   : > { %s2578_s9 = smov %s2573_s23 }
 0x3fb   :  { %1306 = vsyncpa [#allocation4], 1 }
 0x3fc   :  { %1308 = vsyncpa [#allocation4 + $0x1], 1 }
 0x3fd   :  { %1309 = vsyncpa [#allocation6], 1 }
 0x3fe   :  { %1311 = vsyncpa [#allocation6 + $0x1], 1 }
 0x3ff   :  { %1312 = vsyncpa [#allocation9], 1 }

</bundles_post_ra>
